<compile_context>
chip_gen: v7x
topology: tpu7x:2x2x1
jax: 0.10.0
libtpu: 0.0.40
codegen_flags: <defaults>
</compile_context>

<pallas_src>
import math
import numpy as np

import jax
import jax.numpy as jnp
from jax.experimental import pallas as pl
from jax.experimental.pallas import tpu as pltpu

EPS = 1e-6
NEG_LOG_EPS = float(-math.log(EPS))
LANE = 128
SUBLANE = 8


def _round_up(x, m):
    return ((x + m - 1) // m) * m


def _np(x, dtype=np.float32):
    return np.asarray(jax.device_get(x)).astype(dtype)


# ----------------------------------------------------------------------------
# Pallas kernel: fused cost matrices for IMG_BLK images per grid step
# ----------------------------------------------------------------------------
def _l1_cdist(a, g_t):
    """a (IB, Mt, 4), g_t (IB, 4, Gp) -> pairwise L1 distance (IB, Mt, Gp)."""
    c = jnp.abs(a[:, :, 0:1] - g_t[:, 0:1, :])
    for k in range(1, 4):
        c = c + jnp.abs(a[:, :, k:k + 1] - g_t[:, k:k + 1, :])
    return c


def _neg_giou(a, g_t):
    """a (IB, Mt, 4) cxcywh, g_t (IB, 4, Gp) cxcywh (gt, ^T) -> -GIoU."""
    acx, acy = a[:, :, 0:1], a[:, :, 1:2]
    aw, ah = a[:, :, 2:3], a[:, :, 3:4]
    ax1, ay1 = acx - 0.5 * aw, acy - 0.5 * ah
    ax2, ay2 = acx + 0.5 * aw, acy + 0.5 * ah
    gcx, gcy = g_t[:, 0:1, :], g_t[:, 1:2, :]
    gw, gh = g_t[:, 2:3, :], g_t[:, 3:4, :]
    gx1, gy1 = gcx - 0.5 * gw, gcy - 0.5 * gh
    gx2, gy2 = gcx + 0.5 * gw, gcy + 0.5 * gh

    area_a = aw * ah                                   # (IB, Mt, 1)
    area_b = gw * gh                                   # (IB, 1, Gp)

    iw = jnp.maximum(jnp.minimum(ax2, gx2) - jnp.maximum(ax1, gx1), 0.0)
    ih = jnp.maximum(jnp.minimum(ay2, gy2) - jnp.maximum(ay1, gy1), 0.0)
    inter = iw * ih                                    # (IB, Mt, Gp)
    union = area_a + area_b - inter
    ew = jnp.maximum(ax2, gx2) - jnp.minimum(ax1, gx1)
    eh = jnp.maximum(ay2, gy2) - jnp.minimum(ay1, gy1)
    area_e = ew * eh
    # giou = iou - (area_e - union)/area_e  ==  inter/union - 1 + union/area_e
    # Exact divides here (not approx reciprocal) so near-tied assignments
    # match the torch reference. Zero-area boxes divide by 0, like torch.
    giou = inter / union - 1.0 + union / area_e
    return -giou


def _cost_kernel(w_ref, pred_ref, gt_ref, pkl_ref, lab_ref, c_ref):
    # SMEM scalars: [w_object, w_verb, w_bbox, w_giou, K_valid]
    w_object, w_verb = w_ref[0], w_ref[1]
    w_bbox, w_giou = w_ref[2], w_ref[3]
    k_valid = w_ref[4]

    pred = pred_ref[...]                               # (IB, Mt, 16) f32
    bxh = pred[:, :, 0:4]
    bxo = pred[:, :, 4:8]
    obj = pred[:, :, 8:9]                              # (IB, Mt, 1) class id

    gt = gt_ref[...]                                   # (IB, 16, Gp) f32
    gbh_t = gt[:, 0:4, :]
    gbo_t = gt[:, 4:8, :]
    gobj = gt[:, 8:9, :]                               # (IB, 1, Gp)

    # ---- verb classification cost (bf16 MXU matmul, f32 accumulation) ----
    pkl = pkl_ref[...]                                 # (IB, 3, Mt, Kp) bf16
    p0 = pkl[:, 0].astype(jnp.float32)                 # elementwise math in f32
    p1 = pkl[:, 1].astype(jnp.float32)
    lg = pkl[:, 2].astype(jnp.float32)
    scores = jax.nn.sigmoid(lg) * p0 * p1              # 0 in padded K lanes

    lab_t = lab_ref[...]                               # (IB, Kp, Gp) bf16, 0/1
    l_sum = jnp.sum(lab_t.astype(jnp.float32), axis=1, keepdims=True)  # (IB,1,Gp)
    s_sum = jnp.sum(scores, axis=2, keepdims=True)                     # (IB,Mt,1)
    num1 = jnp.einsum('bmk,bkg->bmg', scores.astype(jnp.bfloat16), lab_t,
                      preferred_element_type=jnp.float32)              # (IB,Mt,Gp)
    # (1 - s) @ (1 - l)^T over the K_valid real classes, algebraically
    # (also makes the zero-padding of K safe):
    num2 = (k_valid - s_sum) - l_sum + num1
    nl_sum = k_valid - l_sum
    inv_l = pl.reciprocal(l_sum + EPS, approx=True)    # per-column only: approx OK
    inv_nl = pl.reciprocal(nl_sum + EPS, approx=True)
    cost_verb = -0.5 * (num1 * inv_l + num2 * inv_nl)

    # ---- L1 / GIoU box costs ----
    cost_bbox = jnp.maximum(_l1_cdist(bxh, gbh_t), _l1_cdist(bxo, gbo_t))
    cost_giou = jnp.maximum(_neg_giou(bxh, gbh_t), _neg_giou(bxo, gbo_t))

    # ---- object class cost: log on (Mt,1) only, select on the (Mt,Gp) grid ----
    eq = obj == gobj                                   # (IB, Mt, Gp) bool
    pmax = jnp.max(p0, axis=-1, keepdims=True)         # (IB, Mt, 1)
    neg_log_p = -jnp.log(pmax + EPS)
    cost_object = jnp.where(eq, neg_log_p, NEG_LOG_EPS)

    c_ref[...] = (w_verb * cost_verb + w_bbox * cost_bbox
                  + w_giou * cost_giou + w_object * cost_object)


def _batched_cost_call(weights, pred, gtp, pkl, lab, *, img_blk, tile_m):
    """All inputs packed/padded over the batch. Returns (Bp, Mp, Gp) f32."""
    Bp, Mp, _ = pred.shape
    Kp = pkl.shape[-1]
    Gp = lab.shape[-1]
    grid = (Bp // img_blk, Mp // tile_m)

    return pl.pallas_call(
        _cost_kernel,
        out_shape=jax.ShapeDtypeStruct((Bp, Mp, Gp), jnp.float32),
        grid=grid,
        in_specs=[
            # 5 scalars (4 weights + K) in SMEM: changing weights needs no recompile
            pl.BlockSpec(memory_space=pltpu.MemorySpace.SMEM),
            pl.BlockSpec((img_blk, tile_m, 16), lambda b, m: (b, m, 0)),     # pred
            pl.BlockSpec((img_blk, 16, Gp), lambda b, m: (b, 0, 0)),         # gt (M-resident)
            pl.BlockSpec((img_blk, 3, tile_m, Kp), lambda b, m: (b, 0, m, 0)),  # p0|p1|logits
            pl.BlockSpec((img_blk, Kp, Gp), lambda b, m: (b, 0, 0)),         # labels^T (M-resident)
        ],
        out_specs=pl.BlockSpec((img_blk, tile_m, Gp), lambda b, m: (b, m, 0)),
        compiler_params=pltpu.CompilerParams(
            dimension_semantics=("parallel", "parallel")),
    )(weights, pred, gtp, pkl, lab)


# ----------------------------------------------------------------------------
# Host-side assignment (no Pallas equivalent)
# ----------------------------------------------------------------------------
try:
    from scipy.optimize import linear_sum_assignment as _lsa
except Exception:  # pragma: no cover
    _lsa = None


def _assign(c):
    # TODO(synk): Hungarian linear_sum_assignment is host-side combinatorial
    # control flow with no Pallas equivalent; scipy if available, greedy otherwise.
    c = np.asarray(c, dtype=np.float64)
    if _lsa is not None:
        i, j = _lsa(c)
        return np.asarray(i, dtype=np.int64), np.asarray(j, dtype=np.int64)
    cc = c.copy()
    rows, cols = [], []
    for _ in range(min(cc.shape)):
        i, j = np.unravel_index(np.argmin(cc), cc.shape)
        rows.append(int(i)); cols.append(int(j))
        cc[i, :] = np.inf; cc[:, j] = np.inf
    order = np.argsort(rows)
    return (np.asarray(rows, dtype=np.int64)[order],
            np.asarray(cols, dtype=np.int64)[order])


# ----------------------------------------------------------------------------
# Matcher wrapper: numpy packing -> one kernel launch -> one bulk device_get
# ----------------------------------------------------------------------------
class HungarianMatcher:
    def __init__(self, cost_object=1.0, cost_verb=1.0, cost_bbox=1.0, cost_giou=1.0):
        assert cost_object + cost_verb + cost_bbox + cost_giou, \
            'At least one cost coefficient should be non zero.'
        self.cost_object = cost_object
        self.cost_verb = cost_verb
        self.cost_bbox = cost_bbox
        self.cost_giou = cost_giou
        self.last_cost_device = None

    def __call__(self, bx_h, bx_o, objects, prior, logits, targets):
        B = len(bx_h)
        Ms = [int(np.shape(b)[0]) for b in bx_h]
        Gs = [int(np.shape(t['boxes_h'])[0]) for t in targets]
        K = int(np.shape(logits)[-1])
        offsets = np.cumsum([0] + Ms).astype(np.int64)

        Mp = max(SUBLANE, _round_up(max(Ms), SUBLANE))       # sublane aligned
        if Mp > 512:                                         # M tiling at production sizes
            tile_m = 512
            Mp = _round_up(Mp, tile_m)
        else:
            tile_m = Mp
        Gp = max(LANE, _round_up(max(Gs), LANE))             # lane-dense output
        Kp = max(LANE, _round_up(K, LANE))                   # lane-aligned contraction

        # Multi-image blocking: amortize per-step overhead while keeping >= 2
        # grid steps so both v7x TensorCores get work; cap the per-step rows
        # to stay inside v5e's 16 MiB scoped VMEM default.
        img_blk = max(1, min(8, B // 2))
        while img_blk > 1 and img_blk * tile_m > 4096:
            img_blk //= 2
        Bp = _round_up(B, img_blk)

        # ---- pack everything in numpy (one device_put per fused array) ----
        logits_np = _np(logits)
        pred = np.zeros((Bp, Mp, 16), np.float32)
        pred[..., 0:8] = 0.25              # harmless dummy boxes in padding
        pred[..., 8] = -2.0                # padded pred class: never matches
        gtp = np.zeros((Bp, 16, Gp), np.float32)
        gtp[:, 0:8, :] = 0.25
        gtp[:, 8, :] = -1.0                # padded gt class: never matches
        pkl = np.zeros((Bp, 3, Mp, Kp), np.float32)
        lab = np.zeros((Bp, Kp, Gp), np.float32)

        for im in range(B):
            M, G = Ms[im], Gs[im]
            pred[im, :M, 0:4] = _np(bx_h[im])
            pred[im, :M, 4:8] = _np(bx_o[im])
            pred[im, :M, 8] = _np(objects[im])
            p = _np(prior[im])                               # (2, M, K)
            pkl[im, 0, :M, :K] = p[0]
            pkl[im, 1, :M, :K] = p[1]
            pkl[im, 2, :M, :K] = logits_np[offsets[im]:offsets[im] + M]
            gtp[im, 0:4, :G] = _np(targets[im]['boxes_h']).T
            gtp[im, 4:8, :G] = _np(targets[im]['boxes_o']).T
            gtp[im, 8, :G] = _np(targets[im]['object'])
            lab[im, :K, :G] = _np(targets[im]['labels']).T

        weights = np.array([self.cost_object, self.cost_verb,
                            self.cost_bbox, self.cost_giou, float(K)], np.float32)

        C = _batched_cost_call(
            jnp.asarray(weights),
            jnp.asarray(pred),
            jnp.asarray(gtp),
            jnp.asarray(pkl, dtype=jnp.bfloat16),     # bf16: halves HBM traffic
            jnp.asarray(lab, dtype=jnp.bfloat16),     # labels 0/1 -> lossless
            img_blk=img_blk, tile_m=tile_m)
        self.last_cost_device = C

        # Single bulk device->host transfer; scipy over all images on host.
        C_host = np.asarray(jax.device_get(C))
        indices, cmats = [], []
        for im in range(B):
            c = C_host[im, :Ms[im], :Gs[im]]
            indices.append(_assign(c))
            cmats.append(c)
        return indices, cmats


# ----------------------------------------------------------------------------
# numpy reference (for verification)
# ----------------------------------------------------------------------------
def _ref_cost(bxh, bxo, obj, prior, logits, gt_bh, gt_bo, gt_lab, gt_obj,
              w_object, w_verb, w_bbox, w_giou):
    s = 1.0 / (1.0 + np.exp(-logits.astype(np.float64))) * prior[0] * prior[1]
    l = gt_lab.astype(np.float64)
    cv = -0.5 * (s @ l.T / (l.sum(1)[None] + EPS)
                 + (1 - s) @ (1 - l).T / ((1 - l).sum(1)[None] + EPS))
    cdist = lambda a, b: np.abs(a[:, None, :] - b[None, :, :]).sum(-1)
    cb = np.maximum(cdist(bxh, gt_bh), cdist(bxo, gt_bo))

    def xyxy(x):
        cx, cy, ww, hh = x[:, 0], x[:, 1], x[:, 2], x[:, 3]
        return np.stack([cx - 0.5 * ww, cy - 0.5 * hh, cx + 0.5 * ww, cy + 0.5 * hh], -1)

    def giou(a, b):
        area_a = (a[:, 2] - a[:, 0]) * (a[:, 3] - a[:, 1])
        area_b = (b[:, 2] - b[:, 0]) * (b[:, 3] - b[:, 1])
        lt = np.maximum(a[:, None, :2], b[None, :, :2])
        rb = np.minimum(a[:, None, 2:], b[None, :, 2:])
        wh = np.clip(rb - lt, 0, None)
        inter = wh[..., 0] * wh[..., 1]
        union = area_a[:, None] + area_b[None, :] - inter
        iou = inter / union
        lte = np.minimum(a[:, None, :2], b[None, :, :2])
        rbe = np.maximum(a[:, None, 2:], b[None, :, 2:])
        whe = rbe - lte
        area_e = whe[..., 0] * whe[..., 1]
        return iou - (area_e - union) / area_e

    cg = np.maximum(-giou(xyxy(bxh), xyxy(gt_bh)), -giou(xyxy(bxo), xyxy(gt_bo)))
    eq = (obj[:, None] == gt_obj[None, :]).astype(np.float64)
    co = -np.log(eq * prior[0].max(-1)[:, None] + EPS)
    # same weight->term mapping as the PyTorch module
    return w_verb * cv + w_bbox * cb + w_giou * cg + w_object * co


# ----------------------------------------------------------------------------
if __name__ == "__main__":
    B, M, G, K = 2, 16, 8, 117          # images, pairs, gt pairs, verb classes
    NUM_OBJ = 80
    key = jax.random.PRNGKey(0)
    ks = jax.random.split(key, 12)

    def boxes(k, n):
        cxcy = jax.random.uniform(k, (n, 2), minval=0.2, maxval=0.8)
        wh = jax.random.uniform(jax.random.fold_in(k, 1), (n, 2), minval=0.1, maxval=0.3)
        return jnp.concatenate([cxcy, wh], axis=-1).astype(jnp.float32)

    bx_h = [boxes(ks[0], M), boxes(ks[1], M)]
    bx_o = [boxes(ks[2], M), boxes(ks[3], M)]
    objects = [jax.random.randint(ks[4], (M,), 0, NUM_OBJ, dtype=jnp.int32),
               jax.random.randint(ks[5], (M,), 0, NUM_OBJ, dtype=jnp.int32)]
    prior = [jax.random.uniform(ks[6], (2, M, K), dtype=jnp.float32),
             jax.random.uniform(ks[7], (2, M, K), dtype=jnp.float32)]
    logits = jax.random.normal(ks[8], (B * M, K), dtype=jnp.float32)

    targets = []
    for im in range(B):
        kk = jax.random.fold_in(ks[9], im)
        targets.append({
            'boxes_h': boxes(jax.random.fold_in(kk, 0), G),
            'boxes_o': boxes(jax.random.fold_in(kk, 1), G),
            'labels': (jax.random.uniform(jax.random.fold_in(kk, 2), (G, K)) < 0.2
                       ).astype(jnp.float32),
            'object': jax.random.randint(jax.random.fold_in(kk, 3), (G,), 0, NUM_OBJ,
                                         dtype=jnp.int32),
        })
    # guarantee at least one object-class match per image
    for im in range(B):
        targets[im]['object'] = targets[im]['object'].at[0].set(objects[im][0])

    # distinct weights so the weight -> cost-term mapping is actually verified
    W_OBJ, W_VERB, W_BBOX, W_GIOU = 1.5, 2.0, 0.7, 1.3
    matcher = HungarianMatcher(W_OBJ, W_VERB, W_BBOX, W_GIOU)
    indices, cmats = matcher(bx_h, bx_o, objects, prior, logits, targets)
    jax.block_until_ready(matcher.last_cost_device)

    # verify against numpy reference (tolerance accounts for bf16 verb-branch
    # inputs and the approx EUP reciprocals on the verb denominators)
    for im in range(B):
        ref = _ref_cost(np.asarray(bx_h[im]), np.asarray(bx_o[im]),
                        np.asarray(objects[im]), np.asarray(prior[im]),
                        np.asarray(logits[im * M:(im + 1) * M]),
                        np.asarray(targets[im]['boxes_h']),
                        np.asarray(targets[im]['boxes_o']),
                        np.asarray(targets[im]['labels']),
                        np.asarray(targets[im]['object']),
                        W_OBJ, W_VERB, W_BBOX, W_GIOU)
        np.testing.assert_allclose(cmats[im], ref, rtol=1e-2, atol=2e-2)
        assert len(indices[im][0]) == min(M, G)

    print("KERNEL_OK")
</pallas_src>

<mosaic_0001>
module attributes {stable_mosaic.version = 11 : i64} {
  func.func @_cost_kernel(%arg0: i32, %arg1: i32, %arg2: memref<5xf32, #tpu.memory_space<smem>>, %arg3: memref<1x16x16xf32, #tpu.memory_space<vmem>>, %arg4: memref<1x16x128xf32, #tpu.memory_space<vmem>>, %arg5: memref<1x3x16x128xbf16, #tpu.memory_space<vmem>>, %arg6: memref<1x128x128xbf16, #tpu.memory_space<vmem>>, %arg7: memref<1x16x128xf32, #tpu.memory_space<vmem>>) attributes {dimension_semantics = [#tpu.dimension_semantics<parallel>, #tpu.dimension_semantics<parallel>], iteration_bounds = array<i64: 2, 1>, scalar_prefetch = 0 : i64, scratch_operands = 0 : i64, tpu.core_type = #tpu.core_type<tc>, window_params = [{transform_indices = @transform_0, window_bounds = array<i64: 5>}, {transform_indices = @transform_1, window_bounds = array<i64: 1, 16, 16>}, {transform_indices = @transform_2, window_bounds = array<i64: 1, 16, 128>}, {transform_indices = @transform_3, window_bounds = array<i64: 1, 3, 16, 128>}, {transform_indices = @transform_4, window_bounds = array<i64: 1, 128, 128>}, {transform_indices = @transform_5, window_bounds = array<i64: 1, 16, 128>}]} {
    %c0 = arith.constant 0 : index
    %0 = memref.load %arg2[%c0] : memref<5xf32, #tpu.memory_space<smem>>
    %c1 = arith.constant 1 : index
    %1 = memref.load %arg2[%c1] : memref<5xf32, #tpu.memory_space<smem>>
    %c2 = arith.constant 2 : index
    %2 = memref.load %arg2[%c2] : memref<5xf32, #tpu.memory_space<smem>>
    %c3 = arith.constant 3 : index
    %3 = memref.load %arg2[%c3] : memref<5xf32, #tpu.memory_space<smem>>
    %c4 = arith.constant 4 : index
    %4 = memref.load %arg2[%c4] : memref<5xf32, #tpu.memory_space<smem>>
    %c0_0 = arith.constant 0 : index
    %c0_1 = arith.constant 0 : index
    %c0_2 = arith.constant 0 : index
    %5 = vector.load %arg3[%c0_0, %c0_1, %c0_2] : memref<1x16x16xf32, #tpu.memory_space<vmem>>, vector<1x16x16xf32>
    %6 = vector.extract_strided_slice %5 {offsets = [0, 0, 0], sizes = [1, 16, 4], strides = [1, 1, 1]} : vector<1x16x16xf32> to vector<1x16x4xf32>
    %7 = vector.extract_strided_slice %5 {offsets = [0, 0, 4], sizes = [1, 16, 4], strides = [1, 1, 1]} : vector<1x16x16xf32> to vector<1x16x4xf32>
    %8 = vector.extract_strided_slice %5 {offsets = [0, 0, 8], sizes = [1, 16, 1], strides = [1, 1, 1]} : vector<1x16x16xf32> to vector<1x16x1xf32>
    %c0_3 = arith.constant 0 : index
    %c0_4 = arith.constant 0 : index
    %c0_5 = arith.constant 0 : index
    %9 = vector.load %arg4[%c0_3, %c0_4, %c0_5] : memref<1x16x128xf32, #tpu.memory_space<vmem>>, vector<1x16x128xf32>
    %10 = vector.extract_strided_slice %9 {offsets = [0, 0, 0], sizes = [1, 4, 128], strides = [1, 1, 1]} : vector<1x16x128xf32> to vector<1x4x128xf32>
    %11 = vector.extract_strided_slice %9 {offsets = [0, 4, 0], sizes = [1, 4, 128], strides = [1, 1, 1]} : vector<1x16x128xf32> to vector<1x4x128xf32>
    %12 = vector.extract_strided_slice %9 {offsets = [0, 8, 0], sizes = [1, 1, 128], strides = [1, 1, 1]} : vector<1x16x128xf32> to vector<1x1x128xf32>
    %c0_6 = arith.constant 0 : index
    %c0_7 = arith.constant 0 : index
    %c0_8 = arith.constant 0 : index
    %c0_9 = arith.constant 0 : index
    %13 = vector.load %arg5[%c0_6, %c0_7, %c0_8, %c0_9] : memref<1x3x16x128xbf16, #tpu.memory_space<vmem>>, vector<1x3x16x128xbf16>
    %14 = vector.extract_strided_slice %13 {offsets = [0, 0, 0, 0], sizes = [1, 1, 16, 128], strides = [1, 1, 1, 1]} : vector<1x3x16x128xbf16> to vector<1x1x16x128xbf16>
    %15 = vector.shape_cast %14 : vector<1x1x16x128xbf16> to vector<1x16x128xbf16>
    %16 = arith.extf %15 : vector<1x16x128xbf16> to vector<1x16x128xf32>
    %17 = vector.extract_strided_slice %13 {offsets = [0, 1, 0, 0], sizes = [1, 1, 16, 128], strides = [1, 1, 1, 1]} : vector<1x3x16x128xbf16> to vector<1x1x16x128xbf16>
    %18 = vector.shape_cast %17 : vector<1x1x16x128xbf16> to vector<1x16x128xbf16>
    %19 = arith.extf %18 : vector<1x16x128xbf16> to vector<1x16x128xf32>
    %20 = vector.extract_strided_slice %13 {offsets = [0, 2, 0, 0], sizes = [1, 1, 16, 128], strides = [1, 1, 1, 1]} : vector<1x3x16x128xbf16> to vector<1x1x16x128xbf16>
    %21 = vector.shape_cast %20 : vector<1x1x16x128xbf16> to vector<1x16x128xbf16>
    %22 = arith.extf %21 : vector<1x16x128xbf16> to vector<1x16x128xf32>
    %23 = arith.negf %22 : vector<1x16x128xf32>
    %24 = math.exp %23 : vector<1x16x128xf32>
    %cst = arith.constant 1.000000e+00 : f32
    %25 = vector.broadcast %cst : f32 to vector<1x16x128xf32>
    %26 = arith.addf %25, %24 : vector<1x16x128xf32>
    %27 = arith.divf %25, %26 : vector<1x16x128xf32>
    %28 = arith.mulf %27, %16 : vector<1x16x128xf32>
    %29 = arith.mulf %28, %19 : vector<1x16x128xf32>
    %c0_10 = arith.constant 0 : index
    %c0_11 = arith.constant 0 : index
    %c0_12 = arith.constant 0 : index
    %30 = vector.load %arg6[%c0_10, %c0_11, %c0_12] : memref<1x128x128xbf16, #tpu.memory_space<vmem>>, vector<1x128x128xbf16>
    %31 = arith.extf %30 : vector<1x128x128xbf16> to vector<1x128x128xf32>
    %cst_13 = arith.constant dense<0.000000e+00> : vector<1x128xf32>
    %32 = vector.multi_reduction <add>, %31, %cst_13 [1] : vector<1x128x128xf32> to vector<1x128xf32>
    %33 = vector.shape_cast %32 : vector<1x128xf32> to vector<1x1x128xf32>
    %cst_14 = arith.constant dense<0.000000e+00> : vector<1x16xf32>
    %34 = vector.multi_reduction <add>, %29, %cst_14 [2] : vector<1x16x128xf32> to vector<1x16xf32>
    %35 = vector.shape_cast %34 : vector<1x16xf32> to vector<1x16x1xf32>
    %36 = arith.truncf %29 : vector<1x16x128xf32> to vector<1x16x128xbf16>
    "tpu.trace_start"() <{level = 10 : i32, message = "bmk,bkg->bmg"}> : () -> ()
    %cst_15 = arith.constant dense<0.000000e+00> : vector<1x16x128xf32>
    %37 = tpu.matmul %36, %30, %cst_15 {dimension_numbers = #tpu.dot_dimension_numbers<[2], [1], [1], [2], [0, 0, 0, 1, 1, 2], [0], [0]>} : vector<1x16x128xbf16>, vector<1x128x128xbf16>, vector<1x16x128xf32> -> vector<1x16x128xf32>
    "tpu.trace_stop"() : () -> ()
    %38 = vector.broadcast %4 : f32 to vector<1x16x1xf32>
    %39 = arith.subf %38, %35 : vector<1x16x1xf32>
    %40 = vector.broadcast %39 : vector<1x16x1xf32> to vector<1x16x128xf32>
    %41 = vector.broadcast %33 : vector<1x1x128xf32> to vector<1x16x128xf32>
    %42 = arith.subf %40, %41 : vector<1x16x128xf32>
    %43 = arith.addf %42, %37 : vector<1x16x128xf32>
    %44 = vector.broadcast %4 : f32 to vector<1x1x128xf32>
    %45 = arith.subf %44, %33 : vector<1x1x128xf32>
    %cst_16 = arith.constant 9.99999997E-7 : f32
    %46 = vector.broadcast %cst_16 : f32 to vector<1x1x128xf32>
    %47 = arith.addf %33, %46 : vector<1x1x128xf32>
    %48 = tpu.reciprocal %47 {approx = true} : vector<1x1x128xf32> -> vector<1x1x128xf32>
    %cst_17 = arith.constant 9.99999997E-7 : f32
    %49 = vector.broadcast %cst_17 : f32 to vector<1x1x128xf32>
    %50 = arith.addf %45, %49 : vector<1x1x128xf32>
    %51 = tpu.reciprocal %50 {approx = true} : vector<1x1x128xf32> -> vector<1x1x128xf32>
    %52 = vector.broadcast %48 : vector<1x1x128xf32> to vector<1x16x128xf32>
    %53 = arith.mulf %37, %52 : vector<1x16x128xf32>
    %54 = vector.broadcast %51 : vector<1x1x128xf32> to vector<1x16x128xf32>
    %55 = arith.mulf %43, %54 : vector<1x16x128xf32>
    %56 = arith.addf %53, %55 : vector<1x16x128xf32>
    %cst_18 = arith.constant -5.000000e-01 : f32
    %57 = vector.broadcast %cst_18 : f32 to vector<1x16x128xf32>
    %58 = arith.mulf %57, %56 : vector<1x16x128xf32>
    %59 = vector.extract_strided_slice %6 {offsets = [0, 0, 0], sizes = [1, 16, 1], strides = [1, 1, 1]} : vector<1x16x4xf32> to vector<1x16x1xf32>
    %60 = vector.extract_strided_slice %10 {offsets = [0, 0, 0], sizes = [1, 1, 128], strides = [1, 1, 1]} : vector<1x4x128xf32> to vector<1x1x128xf32>
    %61 = vector.broadcast %59 : vector<1x16x1xf32> to vector<1x16x128xf32>
    %62 = vector.broadcast %60 : vector<1x1x128xf32> to vector<1x16x128xf32>
    %63 = arith.subf %61, %62 : vector<1x16x128xf32>
    %64 = math.absf %63 : vector<1x16x128xf32>
    %65 = vector.extract_strided_slice %6 {offsets = [0, 0, 1], sizes = [1, 16, 1], strides = [1, 1, 1]} : vector<1x16x4xf32> to vector<1x16x1xf32>
    %66 = vector.extract_strided_slice %10 {offsets = [0, 1, 0], sizes = [1, 1, 128], strides = [1, 1, 1]} : vector<1x4x128xf32> to vector<1x1x128xf32>
    %67 = vector.broadcast %65 : vector<1x16x1xf32> to vector<1x16x128xf32>
    %68 = vector.broadcast %66 : vector<1x1x128xf32> to vector<1x16x128xf32>
    %69 = arith.subf %67, %68 : vector<1x16x128xf32>
    %70 = math.absf %69 : vector<1x16x128xf32>
    %71 = arith.addf %64, %70 : vector<1x16x128xf32>
    %72 = vector.extract_strided_slice %6 {offsets = [0, 0, 2], sizes = [1, 16, 1], strides = [1, 1, 1]} : vector<1x16x4xf32> to vector<1x16x1xf32>
    %73 = vector.extract_strided_slice %10 {offsets = [0, 2, 0], sizes = [1, 1, 128], strides = [1, 1, 1]} : vector<1x4x128xf32> to vector<1x1x128xf32>
    %74 = vector.broadcast %72 : vector<1x16x1xf32> to vector<1x16x128xf32>
    %75 = vector.broadcast %73 : vector<1x1x128xf32> to vector<1x16x128xf32>
    %76 = arith.subf %74, %75 : vector<1x16x128xf32>
    %77 = math.absf %76 : vector<1x16x128xf32>
    %78 = arith.addf %71, %77 : vector<1x16x128xf32>
    %79 = vector.extract_strided_slice %6 {offsets = [0, 0, 3], sizes = [1, 16, 1], strides = [1, 1, 1]} : vector<1x16x4xf32> to vector<1x16x1xf32>
    %80 = vector.extract_strided_slice %10 {offsets = [0, 3, 0], sizes = [1, 1, 128], strides = [1, 1, 1]} : vector<1x4x128xf32> to vector<1x1x128xf32>
    %81 = vector.broadcast %79 : vector<1x16x1xf32> to vector<1x16x128xf32>
    %82 = vector.broadcast %80 : vector<1x1x128xf32> to vector<1x16x128xf32>
    %83 = arith.subf %81, %82 : vector<1x16x128xf32>
    %84 = math.absf %83 : vector<1x16x128xf32>
    %85 = arith.addf %78, %84 : vector<1x16x128xf32>
    %86 = vector.extract_strided_slice %7 {offsets = [0, 0, 0], sizes = [1, 16, 1], strides = [1, 1, 1]} : vector<1x16x4xf32> to vector<1x16x1xf32>
    %87 = vector.extract_strided_slice %11 {offsets = [0, 0, 0], sizes = [1, 1, 128], strides = [1, 1, 1]} : vector<1x4x128xf32> to vector<1x1x128xf32>
    %88 = vector.broadcast %86 : vector<1x16x1xf32> to vector<1x16x128xf32>
    %89 = vector.broadcast %87 : vector<1x1x128xf32> to vector<1x16x128xf32>
    %90 = arith.subf %88, %89 : vector<1x16x128xf32>
    %91 = math.absf %90 : vector<1x16x128xf32>
    %92 = vector.extract_strided_slice %7 {offsets = [0, 0, 1], sizes = [1, 16, 1], strides = [1, 1, 1]} : vector<1x16x4xf32> to vector<1x16x1xf32>
    %93 = vector.extract_strided_slice %11 {offsets = [0, 1, 0], sizes = [1, 1, 128], strides = [1, 1, 1]} : vector<1x4x128xf32> to vector<1x1x128xf32>
    %94 = vector.broadcast %92 : vector<1x16x1xf32> to vector<1x16x128xf32>
    %95 = vector.broadcast %93 : vector<1x1x128xf32> to vector<1x16x128xf32>
    %96 = arith.subf %94, %95 : vector<1x16x128xf32>
    %97 = math.absf %96 : vector<1x16x128xf32>
    %98 = arith.addf %91, %97 : vector<1x16x128xf32>
    %99 = vector.extract_strided_slice %7 {offsets = [0, 0, 2], sizes = [1, 16, 1], strides = [1, 1, 1]} : vector<1x16x4xf32> to vector<1x16x1xf32>
    %100 = vector.extract_strided_slice %11 {offsets = [0, 2, 0], sizes = [1, 1, 128], strides = [1, 1, 1]} : vector<1x4x128xf32> to vector<1x1x128xf32>
    %101 = vector.broadcast %99 : vector<1x16x1xf32> to vector<1x16x128xf32>
    %102 = vector.broadcast %100 : vector<1x1x128xf32> to vector<1x16x128xf32>
    %103 = arith.subf %101, %102 : vector<1x16x128xf32>
    %104 = math.absf %103 : vector<1x16x128xf32>
    %105 = arith.addf %98, %104 : vector<1x16x128xf32>
    %106 = vector.extract_strided_slice %7 {offsets = [0, 0, 3], sizes = [1, 16, 1], strides = [1, 1, 1]} : vector<1x16x4xf32> to vector<1x16x1xf32>
    %107 = vector.extract_strided_slice %11 {offsets = [0, 3, 0], sizes = [1, 1, 128], strides = [1, 1, 1]} : vector<1x4x128xf32> to vector<1x1x128xf32>
    %108 = vector.broadcast %106 : vector<1x16x1xf32> to vector<1x16x128xf32>
    %109 = vector.broadcast %107 : vector<1x1x128xf32> to vector<1x16x128xf32>
    %110 = arith.subf %108, %109 : vector<1x16x128xf32>
    %111 = math.absf %110 : vector<1x16x128xf32>
    %112 = arith.addf %105, %111 : vector<1x16x128xf32>
    %113 = arith.maximumf %85, %112 : vector<1x16x128xf32>
    %114 = vector.extract_strided_slice %6 {offsets = [0, 0, 0], sizes = [1, 16, 1], strides = [1, 1, 1]} : vector<1x16x4xf32> to vector<1x16x1xf32>
    %115 = vector.extract_strided_slice %6 {offsets = [0, 0, 1], sizes = [1, 16, 1], strides = [1, 1, 1]} : vector<1x16x4xf32> to vector<1x16x1xf32>
    %116 = vector.extract_strided_slice %6 {offsets = [0, 0, 2], sizes = [1, 16, 1], strides = [1, 1, 1]} : vector<1x16x4xf32> to vector<1x16x1xf32>
    %117 = vector.extract_strided_slice %6 {offsets = [0, 0, 3], sizes = [1, 16, 1], strides = [1, 1, 1]} : vector<1x16x4xf32> to vector<1x16x1xf32>
    %cst_19 = arith.constant 5.000000e-01 : f32
    %118 = vector.broadcast %cst_19 : f32 to vector<1x16x1xf32>
    %119 = arith.mulf %118, %116 : vector<1x16x1xf32>
    %120 = arith.subf %114, %119 : vector<1x16x1xf32>
    %cst_20 = arith.constant 5.000000e-01 : f32
    %121 = vector.broadcast %cst_20 : f32 to vector<1x16x1xf32>
    %122 = arith.mulf %121, %117 : vector<1x16x1xf32>
    %123 = arith.subf %115, %122 : vector<1x16x1xf32>
    %cst_21 = arith.constant 5.000000e-01 : f32
    %124 = vector.broadcast %cst_21 : f32 to vector<1x16x1xf32>
    %125 = arith.mulf %124, %116 : vector<1x16x1xf32>
    %126 = arith.addf %114, %125 : vector<1x16x1xf32>
    %cst_22 = arith.constant 5.000000e-01 : f32
    %127 = vector.broadcast %cst_22 : f32 to vector<1x16x1xf32>
    %128 = arith.mulf %127, %117 : vector<1x16x1xf32>
    %129 = arith.addf %115, %128 : vector<1x16x1xf32>
    %130 = vector.extract_strided_slice %10 {offsets = [0, 0, 0], sizes = [1, 1, 128], strides = [1, 1, 1]} : vector<1x4x128xf32> to vector<1x1x128xf32>
    %131 = vector.extract_strided_slice %10 {offsets = [0, 1, 0], sizes = [1, 1, 128], strides = [1, 1, 1]} : vector<1x4x128xf32> to vector<1x1x128xf32>
    %132 = vector.extract_strided_slice %10 {offsets = [0, 2, 0], sizes = [1, 1, 128], strides = [1, 1, 1]} : vector<1x4x128xf32> to vector<1x1x128xf32>
    %133 = vector.extract_strided_slice %10 {offsets = [0, 3, 0], sizes = [1, 1, 128], strides = [1, 1, 1]} : vector<1x4x128xf32> to vector<1x1x128xf32>
    %cst_23 = arith.constant 5.000000e-01 : f32
    %134 = vector.broadcast %cst_23 : f32 to vector<1x1x128xf32>
    %135 = arith.mulf %134, %132 : vector<1x1x128xf32>
    %136 = arith.subf %130, %135 : vector<1x1x128xf32>
    %cst_24 = arith.constant 5.000000e-01 : f32
    %137 = vector.broadcast %cst_24 : f32 to vector<1x1x128xf32>
    %138 = arith.mulf %137, %133 : vector<1x1x128xf32>
    %139 = arith.subf %131, %138 : vector<1x1x128xf32>
    %cst_25 = arith.constant 5.000000e-01 : f32
    %140 = vector.broadcast %cst_25 : f32 to vector<1x1x128xf32>
    %141 = arith.mulf %140, %132 : vector<1x1x128xf32>
    %142 = arith.addf %130, %141 : vector<1x1x128xf32>
    %cst_26 = arith.constant 5.000000e-01 : f32
    %143 = vector.broadcast %cst_26 : f32 to vector<1x1x128xf32>
    %144 = arith.mulf %143, %133 : vector<1x1x128xf32>
    %145 = arith.addf %131, %144 : vector<1x1x128xf32>
    %146 = arith.mulf %116, %117 : vector<1x16x1xf32>
    %147 = arith.mulf %132, %133 : vector<1x1x128xf32>
    %148 = vector.broadcast %126 : vector<1x16x1xf32> to vector<1x16x128xf32>
    %149 = vector.broadcast %142 : vector<1x1x128xf32> to vector<1x16x128xf32>
    %150 = arith.minimumf %148, %149 : vector<1x16x128xf32>
    %151 = vector.broadcast %120 : vector<1x16x1xf32> to vector<1x16x128xf32>
    %152 = vector.broadcast %136 : vector<1x1x128xf32> to vector<1x16x128xf32>
    %153 = arith.maximumf %151, %152 : vector<1x16x128xf32>
    %154 = arith.subf %150, %153 : vector<1x16x128xf32>
    %cst_27 = arith.constant 0.000000e+00 : f32
    %155 = vector.broadcast %cst_27 : f32 to vector<1x16x128xf32>
    %156 = arith.maximumf %154, %155 : vector<1x16x128xf32>
    %157 = vector.broadcast %129 : vector<1x16x1xf32> to vector<1x16x128xf32>
    %158 = vector.broadcast %145 : vector<1x1x128xf32> to vector<1x16x128xf32>
    %159 = arith.minimumf %157, %158 : vector<1x16x128xf32>
    %160 = vector.broadcast %123 : vector<1x16x1xf32> to vector<1x16x128xf32>
    %161 = vector.broadcast %139 : vector<1x1x128xf32> to vector<1x16x128xf32>
    %162 = arith.maximumf %160, %161 : vector<1x16x128xf32>
    %163 = arith.subf %159, %162 : vector<1x16x128xf32>
    %cst_28 = arith.constant 0.000000e+00 : f32
    %164 = vector.broadcast %cst_28 : f32 to vector<1x16x128xf32>
    %165 = arith.maximumf %163, %164 : vector<1x16x128xf32>
    %166 = arith.mulf %156, %165 : vector<1x16x128xf32>
    %167 = vector.broadcast %146 : vector<1x16x1xf32> to vector<1x16x128xf32>
    %168 = vector.broadcast %147 : vector<1x1x128xf32> to vector<1x16x128xf32>
    %169 = arith.addf %167, %168 : vector<1x16x128xf32>
    %170 = arith.subf %169, %166 : vector<1x16x128xf32>
    %171 = vector.broadcast %126 : vector<1x16x1xf32> to vector<1x16x128xf32>
    %172 = vector.broadcast %142 : vector<1x1x128xf32> to vector<1x16x128xf32>
    %173 = arith.maximumf %171, %172 : vector<1x16x128xf32>
    %174 = vector.broadcast %120 : vector<1x16x1xf32> to vector<1x16x128xf32>
    %175 = vector.broadcast %136 : vector<1x1x128xf32> to vector<1x16x128xf32>
    %176 = arith.minimumf %174, %175 : vector<1x16x128xf32>
    %177 = arith.subf %173, %176 : vector<1x16x128xf32>
    %178 = vector.broadcast %129 : vector<1x16x1xf32> to vector<1x16x128xf32>
    %179 = vector.broadcast %145 : vector<1x1x128xf32> to vector<1x16x128xf32>
    %180 = arith.maximumf %178, %179 : vector<1x16x128xf32>
    %181 = vector.broadcast %123 : vector<1x16x1xf32> to vector<1x16x128xf32>
    %182 = vector.broadcast %139 : vector<1x1x128xf32> to vector<1x16x128xf32>
    %183 = arith.minimumf %181, %182 : vector<1x16x128xf32>
    %184 = arith.subf %180, %183 : vector<1x16x128xf32>
    %185 = arith.mulf %177, %184 : vector<1x16x128xf32>
    %186 = arith.divf %166, %170 : vector<1x16x128xf32>
    %cst_29 = arith.constant 1.000000e+00 : f32
    %187 = vector.broadcast %cst_29 : f32 to vector<1x16x128xf32>
    %188 = arith.subf %186, %187 : vector<1x16x128xf32>
    %189 = arith.divf %170, %185 : vector<1x16x128xf32>
    %190 = arith.addf %188, %189 : vector<1x16x128xf32>
    %cst_30 = arith.constant 0.000000e+00 : f32
    %191 = vector.broadcast %cst_30 : f32 to vector<1x16x128xf32>
    %192 = arith.subf %191, %190 : vector<1x16x128xf32>
    %193 = vector.extract_strided_slice %7 {offsets = [0, 0, 0], sizes = [1, 16, 1], strides = [1, 1, 1]} : vector<1x16x4xf32> to vector<1x16x1xf32>
    %194 = vector.extract_strided_slice %7 {offsets = [0, 0, 1], sizes = [1, 16, 1], strides = [1, 1, 1]} : vector<1x16x4xf32> to vector<1x16x1xf32>
    %195 = vector.extract_strided_slice %7 {offsets = [0, 0, 2], sizes = [1, 16, 1], strides = [1, 1, 1]} : vector<1x16x4xf32> to vector<1x16x1xf32>
    %196 = vector.extract_strided_slice %7 {offsets = [0, 0, 3], sizes = [1, 16, 1], strides = [1, 1, 1]} : vector<1x16x4xf32> to vector<1x16x1xf32>
    %cst_31 = arith.constant 5.000000e-01 : f32
    %197 = vector.broadcast %cst_31 : f32 to vector<1x16x1xf32>
    %198 = arith.mulf %197, %195 : vector<1x16x1xf32>
    %199 = arith.subf %193, %198 : vector<1x16x1xf32>
    %cst_32 = arith.constant 5.000000e-01 : f32
    %200 = vector.broadcast %cst_32 : f32 to vector<1x16x1xf32>
    %201 = arith.mulf %200, %196 : vector<1x16x1xf32>
    %202 = arith.subf %194, %201 : vector<1x16x1xf32>
    %cst_33 = arith.constant 5.000000e-01 : f32
    %203 = vector.broadcast %cst_33 : f32 to vector<1x16x1xf32>
    %204 = arith.mulf %203, %195 : vector<1x16x1xf32>
    %205 = arith.addf %193, %204 : vector<1x16x1xf32>
    %cst_34 = arith.constant 5.000000e-01 : f32
    %206 = vector.broadcast %cst_34 : f32 to vector<1x16x1xf32>
    %207 = arith.mulf %206, %196 : vector<1x16x1xf32>
    %208 = arith.addf %194, %207 : vector<1x16x1xf32>
    %209 = vector.extract_strided_slice %11 {offsets = [0, 0, 0], sizes = [1, 1, 128], strides = [1, 1, 1]} : vector<1x4x128xf32> to vector<1x1x128xf32>
    %210 = vector.extract_strided_slice %11 {offsets = [0, 1, 0], sizes = [1, 1, 128], strides = [1, 1, 1]} : vector<1x4x128xf32> to vector<1x1x128xf32>
    %211 = vector.extract_strided_slice %11 {offsets = [0, 2, 0], sizes = [1, 1, 128], strides = [1, 1, 1]} : vector<1x4x128xf32> to vector<1x1x128xf32>
    %212 = vector.extract_strided_slice %11 {offsets = [0, 3, 0], sizes = [1, 1, 128], strides = [1, 1, 1]} : vector<1x4x128xf32> to vector<1x1x128xf32>
    %cst_35 = arith.constant 5.000000e-01 : f32
    %213 = vector.broadcast %cst_35 : f32 to vector<1x1x128xf32>
    %214 = arith.mulf %213, %211 : vector<1x1x128xf32>
    %215 = arith.subf %209, %214 : vector<1x1x128xf32>
    %cst_36 = arith.constant 5.000000e-01 : f32
    %216 = vector.broadcast %cst_36 : f32 to vector<1x1x128xf32>
    %217 = arith.mulf %216, %212 : vector<1x1x128xf32>
    %218 = arith.subf %210, %217 : vector<1x1x128xf32>
    %cst_37 = arith.constant 5.000000e-01 : f32
    %219 = vector.broadcast %cst_37 : f32 to vector<1x1x128xf32>
    %220 = arith.mulf %219, %211 : vector<1x1x128xf32>
    %221 = arith.addf %209, %220 : vector<1x1x128xf32>
    %cst_38 = arith.constant 5.000000e-01 : f32
    %222 = vector.broadcast %cst_38 : f32 to vector<1x1x128xf32>
    %223 = arith.mulf %222, %212 : vector<1x1x128xf32>
    %224 = arith.addf %210, %223 : vector<1x1x128xf32>
    %225 = arith.mulf %195, %196 : vector<1x16x1xf32>
    %226 = arith.mulf %211, %212 : vector<1x1x128xf32>
    %227 = vector.broadcast %205 : vector<1x16x1xf32> to vector<1x16x128xf32>
    %228 = vector.broadcast %221 : vector<1x1x128xf32> to vector<1x16x128xf32>
    %229 = arith.minimumf %227, %228 : vector<1x16x128xf32>
    %230 = vector.broadcast %199 : vector<1x16x1xf32> to vector<1x16x128xf32>
    %231 = vector.broadcast %215 : vector<1x1x128xf32> to vector<1x16x128xf32>
    %232 = arith.maximumf %230, %231 : vector<1x16x128xf32>
    %233 = arith.subf %229, %232 : vector<1x16x128xf32>
    %cst_39 = arith.constant 0.000000e+00 : f32
    %234 = vector.broadcast %cst_39 : f32 to vector<1x16x128xf32>
    %235 = arith.maximumf %233, %234 : vector<1x16x128xf32>
    %236 = vector.broadcast %208 : vector<1x16x1xf32> to vector<1x16x128xf32>
    %237 = vector.broadcast %224 : vector<1x1x128xf32> to vector<1x16x128xf32>
    %238 = arith.minimumf %236, %237 : vector<1x16x128xf32>
    %239 = vector.broadcast %202 : vector<1x16x1xf32> to vector<1x16x128xf32>
    %240 = vector.broadcast %218 : vector<1x1x128xf32> to vector<1x16x128xf32>
    %241 = arith.maximumf %239, %240 : vector<1x16x128xf32>
    %242 = arith.subf %238, %241 : vector<1x16x128xf32>
    %cst_40 = arith.constant 0.000000e+00 : f32
    %243 = vector.broadcast %cst_40 : f32 to vector<1x16x128xf32>
    %244 = arith.maximumf %242, %243 : vector<1x16x128xf32>
    %245 = arith.mulf %235, %244 : vector<1x16x128xf32>
    %246 = vector.broadcast %225 : vector<1x16x1xf32> to vector<1x16x128xf32>
    %247 = vector.broadcast %226 : vector<1x1x128xf32> to vector<1x16x128xf32>
    %248 = arith.addf %246, %247 : vector<1x16x128xf32>
    %249 = arith.subf %248, %245 : vector<1x16x128xf32>
    %250 = vector.broadcast %205 : vector<1x16x1xf32> to vector<1x16x128xf32>
    %251 = vector.broadcast %221 : vector<1x1x128xf32> to vector<1x16x128xf32>
    %252 = arith.maximumf %250, %251 : vector<1x16x128xf32>
    %253 = vector.broadcast %199 : vector<1x16x1xf32> to vector<1x16x128xf32>
    %254 = vector.broadcast %215 : vector<1x1x128xf32> to vector<1x16x128xf32>
    %255 = arith.minimumf %253, %254 : vector<1x16x128xf32>
    %256 = arith.subf %252, %255 : vector<1x16x128xf32>
    %257 = vector.broadcast %208 : vector<1x16x1xf32> to vector<1x16x128xf32>
    %258 = vector.broadcast %224 : vector<1x1x128xf32> to vector<1x16x128xf32>
    %259 = arith.maximumf %257, %258 : vector<1x16x128xf32>
    %260 = vector.broadcast %202 : vector<1x16x1xf32> to vector<1x16x128xf32>
    %261 = vector.broadcast %218 : vector<1x1x128xf32> to vector<1x16x128xf32>
    %262 = arith.minimumf %260, %261 : vector<1x16x128xf32>
    %263 = arith.subf %259, %262 : vector<1x16x128xf32>
    %264 = arith.mulf %256, %263 : vector<1x16x128xf32>
    %265 = arith.divf %245, %249 : vector<1x16x128xf32>
    %cst_41 = arith.constant 1.000000e+00 : f32
    %266 = vector.broadcast %cst_41 : f32 to vector<1x16x128xf32>
    %267 = arith.subf %265, %266 : vector<1x16x128xf32>
    %268 = arith.divf %249, %264 : vector<1x16x128xf32>
    %269 = arith.addf %267, %268 : vector<1x16x128xf32>
    %cst_42 = arith.constant 0.000000e+00 : f32
    %270 = vector.broadcast %cst_42 : f32 to vector<1x16x128xf32>
    %271 = arith.subf %270, %269 : vector<1x16x128xf32>
    %272 = arith.maximumf %192, %271 : vector<1x16x128xf32>
    %273 = vector.broadcast %8 : vector<1x16x1xf32> to vector<1x16x128xf32>
    %274 = vector.broadcast %12 : vector<1x1x128xf32> to vector<1x16x128xf32>
    %275 = arith.cmpf oeq, %273, %274 : vector<1x16x128xf32>
    %cst_43 = arith.constant dense<0xFF800000> : vector<1x16xf32>
    %276 = vector.multi_reduction <maximumf>, %16, %cst_43 [2] : vector<1x16x128xf32> to vector<1x16xf32>
    %277 = vector.shape_cast %276 : vector<1x16xf32> to vector<1x16x1xf32>
    %cst_44 = arith.constant 9.99999997E-7 : f32
    %278 = vector.broadcast %cst_44 : f32 to vector<1x16x1xf32>
    %279 = arith.addf %277, %278 : vector<1x16x1xf32>
    %280 = math.log %279 : vector<1x16x1xf32>
    %cst_45 = arith.constant 0.000000e+00 : f32
    %281 = vector.broadcast %cst_45 : f32 to vector<1x16x1xf32>
    %282 = arith.subf %281, %280 : vector<1x16x1xf32>
    %cst_46 = arith.constant 13.8155107 : f32
    %283 = vector.shape_cast %282 : vector<1x16x1xf32> to vector<1x16x1xf32>
    %284 = vector.broadcast %283 : vector<1x16x1xf32> to vector<1x16x128xf32>
    %285 = vector.broadcast %cst_46 : f32 to vector<1x16x128xf32>
    %286 = arith.select %275, %284, %285 : vector<1x16x128xi1>, vector<1x16x128xf32>
    %287 = vector.broadcast %1 : f32 to vector<1x16x128xf32>
    %288 = arith.mulf %287, %58 : vector<1x16x128xf32>
    %289 = vector.broadcast %2 : f32 to vector<1x16x128xf32>
    %290 = arith.mulf %289, %113 : vector<1x16x128xf32>
    %291 = arith.addf %288, %290 : vector<1x16x128xf32>
    %292 = vector.broadcast %3 : f32 to vector<1x16x128xf32>
    %293 = arith.mulf %292, %272 : vector<1x16x128xf32>
    %294 = arith.addf %291, %293 : vector<1x16x128xf32>
    %295 = vector.broadcast %0 : f32 to vector<1x16x128xf32>
    %296 = arith.mulf %295, %286 : vector<1x16x128xf32>
    %297 = arith.addf %294, %296 : vector<1x16x128xf32>
    %c0_47 = arith.constant 0 : index
    %c0_48 = arith.constant 0 : index
    %c0_49 = arith.constant 0 : index
    %298 = vector.load %arg7[%c0_47, %c0_48, %c0_49] : memref<1x16x128xf32, #tpu.memory_space<vmem>>, vector<1x16x128xf32>
    tpu.vector_store %arg7[%c0_47, %c0_48, %c0_49], %297 {strides = array<i32>} : memref<1x16x128xf32, #tpu.memory_space<vmem>>, vector<1x16x128xf32>,
    return
  }
  func.func @transform_0(%arg0: i32, %arg1: i32) -> i32 {
    %c0_i32 = arith.constant 0 : i32
    %c0_i32_0 = arith.constant 0 : i32
    return %c0_i32 : i32
  }
  func.func @transform_1(%arg0: i32, %arg1: i32) -> (i32, i32, i32) {
    %c0_i32 = arith.constant 0 : i32
    %c0_i32_0 = arith.constant 0 : i32
    return %arg0, %arg1, %c0_i32 : i32, i32, i32
  }
  func.func @transform_2(%arg0: i32, %arg1: i32) -> (i32, i32, i32) {
    %c0_i32 = arith.constant 0 : i32
    %c0_i32_0 = arith.constant 0 : i32
    %c0_i32_1 = arith.constant 0 : i32
    return %arg0, %c0_i32, %c0_i32_0 : i32, i32, i32
  }
  func.func @transform_3(%arg0: i32, %arg1: i32) -> (i32, i32, i32, i32) {
    %c0_i32 = arith.constant 0 : i32
    %c0_i32_0 = arith.constant 0 : i32
    %c0_i32_1 = arith.constant 0 : i32
    return %arg0, %c0_i32, %arg1, %c0_i32_0 : i32, i32, i32, i32
  }
  func.func @transform_4(%arg0: i32, %arg1: i32) -> (i32, i32, i32) {
    %c0_i32 = arith.constant 0 : i32
    %c0_i32_0 = arith.constant 0 : i32
    %c0_i32_1 = arith.constant 0 : i32
    return %arg0, %c0_i32, %c0_i32_0 : i32, i32, i32
  }
  func.func @transform_5(%arg0: i32, %arg1: i32) -> (i32, i32, i32) {
    %c0_i32 = arith.constant 0 : i32
    %c0_i32_0 = arith.constant 0 : i32
    return %arg0, %arg1, %c0_i32 : i32, i32, i32
  }
}

</mosaic_0001>

<bundles_post_ra>
// kernel: tpu_custom_call.1
= control target key start
LH: loop header
LB: loop body
LE: loop exit
PB: predicated region body
PF: predicated region fallthrough
CT: control target
= control target key end

     0   :  { %s2448_s0 = inlined_call_operand.hbm [shape: f32[5], index: 0, kind: input, shape index: {}]   ;;  %s2449_s1 = inlined_call_operand.hbm [shape: f32[2,16,16], index: 1, kind: input, shape index: {}]   ;;  %s2450_s2 = inlined_call_operand.hbm [shape: f32[2,16,128], index: 2, kind: input, shape index: {}]   ;;  %s2451_s3 = inlined_call_operand.hbm [shape: bf16[2,3,16,128], index: 3, kind: input, shape index: {}]   ;;  %s2452_s4 = inlined_call_operand.hbm [shape: bf16[2,128,128], index: 4, kind: input, shape index: {}]   ;;  %s2453_s5 = inlined_call_operand.hbm [shape: f32[2,16,128], index: 5, kind: output, shape index: {}]  }
   0x1   :  { %2466 = sst [smem:[#allocation22_spill]] %s2449_s1 }
   0x2   :  { %2467 = sst [smem:[#allocation23_spill]] %s2450_s2 }
   0x3   :  { %10 = vsyncpa [#allocation5], 0 }
   0x4   :  { %11 = vsyncpa [#allocation3], 0 }
   0x5   :  { %13 = vsyncpa [#allocation3 + $0x1], 0 }
   0x6   :  { %14 = vsyncpa [#allocation8], 0 }
   0x7   :  { %16 = vsyncpa [#allocation8 + $0x1], 0 }
   0x8   :  { %17 = vsyncpa [#allocation11], 0 }
   0x9   :  { %19 = vsyncpa [#allocation11 + $0x1], 0 }
   0xa   :  { %20 = vsyncpa [#allocation4], 0 }
   0xb   :  { %22 = vsyncpa [#allocation4 + $0x1], 0  ;;  %s1796_s18 = smov 0   ;;  %s1798_s19 = smov 0  }
   0xc   :  { %s1800_s20 = smov 0   ;;  %s1802_s21 = smov 0  }
   0xd   :  { %s1804_s22 = smov 0   ;;  %s1806_s23 = smov 0  }
   0xe LB: > { %2468 = sst [smem:[#allocation18_spill]] %s1727_s20  ;;  %s40_s24 = sadd.s32 1, %s1735_s22  ;;  %s1739_s23 = sphi %s1806_s23, %s28_s23   ;;  %s1735_s22 = sphi %s1804_s22, %s2501_s22   ;;  %s1731_s21 = sphi %s1802_s21, %s2500_s21   ;;  %s1727_s20 = sphi %s1800_s20, %s2496_s20   ;;  %s1723_s19 = sphi %s1798_s19, %s2499_s19   ;;  %s1719_s18 = sphi %s1796_s18, %s2498_s18  }
   0xf   : > { %2469 = sst [smem:[#allocation19_spill]] %s1739_s23  ;;  %s70_s25 = sadd.s32 1, %s1727_s20 }
  0x10   : > { %p42_p0 = scmp.ge.s32.totalorder %s40_s24, 2  ;;  %p2454_p1 = scmp.ne.s32.totalorder %s1727_s20, %s1723_s19 }
  0x11   : > { %p78_p2 = scmp.eq.s32.totalorder %s1739_s23, 0  ;;  %p1368_p5 = scmp.lt.s32.totalorder %s1739_s23, 2 }
  0x12   : > { %s2503_s24 = smov (%p42_p0, %s40_s24), 0  ;;  %s1841_s27 = sand.u32 1, %s1727_s20  }
  0x13   : > { %2470 = sst [smem:[#allocation20_spill]] %s2503_s24  ;;  %p79_p4 = por %p78_p2, %p2454_p1 }
  0x14   : > { %s65_s26 = ssub.s32 %s1735_s22, %s2503_s24  ;;  %s1243_s28 = sshll.u32 %s1841_s27, 4 }
  0x15   : > { %p68_p6 = scmp.eq.s32.totalorder %s65_s26, 0  ;;  %s1282_s29 = sshll.u32 %s1735_s22, 8 }
  0x16   : > { %p1845_p7 = pnand %p1368_p5, %p79_p4  ;;  %s247_s7 = sand.u32 1, %s1739_s23  }
  0x17   : > { %s1850_s6 = scalar_select %p68_p6, %s1727_s20, %s70_s25  }
  0x18   : > { %s2473_s2 = sld [smem:[#allocation23_spill]]  ;;  %s251_s11 = scalar_lea.vmem [#allocation7], %s1243_s28 }
  0x19   : > { %2472 = sst [smem:[#allocation21_spill]] %s1850_s6  ;;  %s258_s12 = sshll.u32 %s251_s11, 4  ;;  %s1862_s12 = int_to_ptr.vmem [resolvable:$true] %s258_s12 }
  0x1a   : > { %s1864_s13 = scalar_lea.sflag [#allocation8], %s247_s7  ;;  %p1870_p9 = pneg %p1845_p7 }
  0x1e   : > { %s1858_s10 = scalar_lea.hbm %s2473_s2, %s1282_s29  ;;  %s1517_s25 = scalar_lea.hbm %s2473_s2, 512 }
  0x1f   : > { %s1512_s14 = scalar_lea.hbm %s1858_s10, 256  ;;  %p1518_p12 = scmp.lt.u32.totalorder %s1858_s10, %s2473_s2 }
  0x20   : > { %p1513_p8 = scmp.ne.s32.totalorder %s1858_s10, %s1512_s14  ;;  %p1519_p13 = scmp.lt.u32.totalorder %s1517_s25, %s1512_s14 }
  0x21   : > { %p1521_p2 = scmp.lt.u32.totalorder %s1512_s14, %s1858_s10 }
  0x22   : > { %p1515_p10 = pnand %p1870_p9, %p1513_p8  ;;  %p1520_p0 = por %p1519_p13, %p1518_p12 }
  0x24   : > { %p1516_p11 = pneg %p1515_p10  ;;  %p1522_p4 = por %p1521_p2, %p1520_p0 }
  0x26   : > { %p1523_p5 = pnand %p1522_p4, %p1516_p11 }
  0x28   : > { %1526 = shalt.err (!%p1523_p5)
}
  0x29   : > { %s1527_s7 = scalar_lea.vmem %s1862_s12, 256  ;;  %s1741_s9 = smov [#allocation7]  }
  0x2a   : > { %p1528_p6 = scmp.ne.s32.totalorder %s1862_s12, %s1527_s7  ;;  %s1532_s11 = sshll.u32 %s1741_s9, 4  ;;  %s1533_s11 = int_to_ptr.vmem [resolvable:$false] %s1532_s11 }
  0x2b   : > { %s1534_s16 = scalar_lea.vmem %s1533_s11, 512  ;;  %p1535_p3 = scmp.lt.s32.totalorder %s1862_s12, %s1533_s11 }
  0x2c   : > { %p1530_p8 = pnand %p1528_p6, %p1870_p9  ;;  %p1536_p1 = scmp.lt.s32.totalorder %s1534_s16, %s1527_s7 }
  0x2e   : > { %p1531_p10 = pneg %p1530_p8  ;;  %p1537_p12 = por %p1536_p1, %p1535_p3 }
  0x30   : > { %p1538_p13 = pnand %p1537_p12, %p1531_p10 }
  0x32   : > { %1541 = shalt.err (!%p1538_p13)
}
  0x33   : > { %s2455_s14 = smov 128   ;;  %s2456_s17 = smov 8  }
  0x34   : > { %1356 = dma.hbm_to_vmem [thread:$0]  (!%p1845_p7), %s1858_s10, 256, %s1862_s12, %s1864_s13, %s2455_s14, %s2455_s14, %s2456_s17  }
  0x35   : > { %s1898_s25 = sadd.s32 4294967295, %s1739_s23   ;;  %s1239_s26 = sadd.s32 4294967294, %s1739_s23  }
  0x36   : > { %p83_p1 = scmp.ne.s32.totalorder %s1723_s19, %s1719_s18  ;;  %p2459_p3 = scmp.eq.s32.totalorder %s1898_s25, 0 }
  0x37   : > { %p189_p11 = scmp.eq.s32.totalorder %s1898_s25, 1  ;;  %p195_p0 = scmp.eq.s32.totalorder %s1239_s26, 1 }
  0x38   : > { %p1240_p2 = scmp.ge.s32.totalorder %s1739_s23, 1  ;;  %p1908_p4 = por %p2459_p3, %p83_p1 }
  0x39   : > { %p2476_p5 = scmp.ne.s32.totalorder %s1727_s20, %s1723_s19  ;;  %p1919_p8 = por %p195_p0, %p83_p1 }
  0x3a   : > { %s2475_s8 = scalar_select %p1908_p4, 1, 0 }
  0x3b   : > { %p1915_p6 = por %p189_p11, %p2476_p5  ;;  %p202_p10 = scmp.lt.s32.totalorder %s1739_s23, 3 }
  0x3c   : > { %s2478_s12 = scalar_select %p1919_p8, 1, 0 }
  0x3d   : > { %s2477_s10 = scalar_select %p1915_p6, 1, 0 }
  0x3e   : > { %p1924_p12 = pnand %p1240_p2, %p202_p10  ;;  %s2480_s1 = sld [smem:[#allocation22_spill]] }
  0x3f   : > { %s228_s26 = scalar_lea.vmem [#allocation6], %s1243_s28 }
  0x40   : > { %s2479_s7 = scalar_select %p1924_p12, 1, 0 }
  0x41   : > { %p1346_p13 = pneg %p1924_p12  ;;  %s237_s14 = sshll.u32 %s228_s26, 4  ;;  %s1939_s14 = int_to_ptr.vmem [resolvable:$true] %s237_s14 }
  0x43   : > { %p1944_p1 = pnand %p1346_p13, %p2459_p3 }
  0x44   : > { %s1933_s16 = scalar_lea.hbm %s2480_s1, %s1282_s29  ;;  %s225_s29 = scalar_lea.sflag [#allocation3], %s1841_s27 }
  0x45   : > { %s2481_s2 = scalar_select %p1944_p1, 1, 0 }
  0x46   : > { %s1542_s11 = scalar_lea.hbm %s1933_s16, 256  ;;  %s1547_s28 = scalar_lea.hbm %s2480_s1, 512 }
  0x47   : > { %p1543_p11 = scmp.ne.s32.totalorder %s1933_s16, %s1542_s11  ;;  %p1548_p5 = scmp.lt.u32.totalorder %s1933_s16, %s2480_s1 }
  0x48   : > { %p1549_p10 = scmp.lt.u32.totalorder %s1547_s28, %s1542_s11  ;;  %p1551_p3 = scmp.lt.u32.totalorder %s1542_s11, %s1933_s16 }
  0x49   : > { %p1545_p0 = pnand %p1543_p11, %p1870_p9 }
  0x4a   : > { %p1550_p13 = por %p1549_p10, %p1548_p5 }
  0x4b   : > { %p1546_p2 = pneg %p1545_p0 }
  0x4c   : > { %p1552_p8 = por %p1551_p3, %p1550_p13 }
  0x4e   : > { %p1553_p6 = pnand %p1552_p8, %p1546_p2 }
  0x50   : > { %1556 = shalt.err (!%p1553_p6)
}
  0x51   : > { %s1557_s17 = scalar_lea.vmem %s1939_s14, 256  ;;  %s1744_s24 = smov [#allocation6]  }
  0x52   : > { %p1558_p11 = scmp.ne.s32.totalorder %s1939_s14, %s1557_s17  ;;  %s1562_s6 = sshll.u32 %s1744_s24, 4  ;;  %s1563_s6 = int_to_ptr.vmem [resolvable:$false] %s1562_s6 }
  0x53   : > { %s1564_s20 = scalar_lea.vmem %s1563_s6, 512  ;;  %p1565_p12 = scmp.lt.s32.totalorder %s1939_s14, %s1563_s6 }
  0x54   : > { %p1560_p0 = pnand %p1558_p11, %p1870_p9  ;;  %p1566_p1 = scmp.lt.s32.totalorder %s1564_s20, %s1557_s17 }
  0x56   : > { %p1561_p4 = pneg %p1560_p0  ;;  %p1567_p5 = por %p1566_p1, %p1565_p12 }
  0x58   : > { %p1568_p10 = pnand %p1567_p5, %p1561_p4 }
  0x5a   : > { %1571 = shalt.err (!%p1568_p10)
}
  0x5b   : > { %s2482_s11 = smov 8   ;;  %s2483_s28 = smov 128  }
  0x5c   : > { %1353 = dma.hbm_to_vmem [thread:$0]  (!%p1845_p7), %s1933_s16, 256, %s1939_s14, %s225_s29, %s2483_s28, %s2483_s28, %s2482_s11  }
  0x5d   : > { %s1572_s9 = scalar_lea.hbm %s2448_s0, 16  ;;  %p2484_p4 = scmp.ne.s32.totalorder %s2481_s2, 0 }
  0x5e   : > { %p1573_p3 = scmp.ne.s32.totalorder %s2448_s0, %s1572_s9  ;;  %p1579_p1 = scmp.lt.u32.totalorder %s1572_s9, %s2448_s0 }
  0x5f   : > { %p1574_p6 = pneg %p2484_p4 }
  0x61   : > { %p1575_p8 = pnand %p1574_p6, %p1573_p3 }
  0x63   : > { %p1576_p12 = pneg %p1575_p8 }
  0x65   : > { %p1581_p2 = pnand %p1579_p1, %p1576_p12 }
  0x67   : > { %1584 = shalt.err (!%p1581_p2)
}
  0x68   : > { %s1745_s23 = smov [#allocation2]   ;;  %s2485_s29 = smul.u32 384, %s1735_s22 }
  0x69   : > { %1349 = dma.hbm_to_smem (!%p2484_p4), %s2448_s0, 16, %s1745_s23, [#allocation5]  }
  0x6a   : > { %s1997_s26 = scalar_lea.hbm %s2451_s3, %s2485_s29  ;;  %s2486_s1 = smul.u32 24, %s1841_s27 }
  0x6b   : > { %s1585_s24 = scalar_lea.hbm %s1997_s26, 384  ;;  %s1590_s17 = scalar_lea.hbm %s2451_s3, 768 }
  0x6c   : > { %s272_s9 = scalar_lea.vmem [#allocation9], %s2486_s1  ;;  %p1586_p13 = scmp.ne.s32.totalorder %s1997_s26, %s1585_s24 }
  0x6d   : > { %s281_s2 = sshll.u32 %s272_s9, 4  ;;  %p1591_p5 = scmp.lt.u32.totalorder %s1997_s26, %s2451_s3  ;;  %s2001_s2 = int_to_ptr.vmem [resolvable:$true] %s281_s2 }
  0x6e   : > { %p1588_p11 = pnand %p1586_p13, %p1870_p9  ;;  %p1592_p10 = scmp.lt.u32.totalorder %s1590_s17, %s1585_s24 }
  0x6f   : > { %p1594_p4 = scmp.lt.u32.totalorder %s1585_s24, %s1997_s26 }
  0x70   : > { %p1589_p0 = pneg %p1588_p11  ;;  %p1593_p3 = por %p1592_p10, %p1591_p5 }
  0x72   : > { %p1595_p6 = por %p1594_p4, %p1593_p3 }
  0x74   : > { %p1596_p8 = pnand %p1595_p6, %p1589_p0 }
  0x76   : > { %1599 = shalt.err (!%p1596_p8)
}
  0x77   : > { %s1600_s16 = scalar_lea.vmem %s2001_s2, 384  ;;  %s1746_s29 = smov [#allocation9]  }
  0x78   : > { %p1601_p12 = scmp.ne.s32.totalorder %s2001_s2, %s1600_s16  ;;  %s1605_s11 = sshll.u32 %s1746_s29, 4  ;;  %s1606_s11 = int_to_ptr.vmem [resolvable:$false] %s1605_s11 }
  0x79   : > { %s1607_s28 = scalar_lea.vmem %s1606_s11, 768  ;;  %p1608_p13 = scmp.lt.s32.totalorder %s2001_s2, %s1606_s11 }
  0x7a   : > { %p1603_p1 = pnand %p1601_p12, %p1870_p9  ;;  %p1609_p11 = scmp.lt.s32.totalorder %s1607_s28, %s1600_s16 }
  0x7c   : > { %p1604_p2 = pneg %p1603_p1  ;;  %p1610_p5 = por %p1609_p11, %p1608_p13 }
  0x7e   : > { %p1611_p10 = pnand %p1610_p5, %p1604_p2 }
  0x80   : > { %1614 = shalt.err (!%p1611_p10)
}
  0x81   : > { %s1747_s1 = smov 64   ;;  %s1748_s9 = smov 4  }
  0x82   : > { %1359 = dma.hbm_to_vmem [thread:$0]  (!%p1845_p7), %s1997_s26, 384, %s2001_s2, %s1864_s13, %s1747_s1, %s1747_s1, %s1748_s9  }
  0x83   : > { %s1250_s24 = sshll.u32 %s1841_s27, 6  ;;  %s1284_s23 = sshll.u32 %s1735_s22, 10 }
  0x84   : > { %s2033_s20 = scalar_lea.hbm %s2452_s4, %s1284_s23  ;;  %s295_s14 = scalar_lea.vmem [#allocation10], %s1250_s24 }
  0x85   : > { %s302_s16 = sshll.u32 %s295_s14, 4  ;;  %s292_s29 = scalar_lea.sflag [#allocation11], %s1841_s27  ;;  %s2035_s16 = int_to_ptr.vmem [resolvable:$true] %s302_s16 }
  0x86   : > { %s1615_s11 = scalar_lea.hbm %s2033_s20, 1024  ;;  %s1620_s2 = scalar_lea.hbm %s2452_s4, 2048 }
  0x87   : > { %p1616_p0 = scmp.ne.s32.totalorder %s2033_s20, %s1615_s11  ;;  %p1621_p6 = scmp.lt.u32.totalorder %s2033_s20, %s2452_s4 }
  0x88   : > { %p1622_p8 = scmp.lt.u32.totalorder %s1620_s2, %s1615_s11  ;;  %p1624_p1 = scmp.lt.u32.totalorder %s1615_s11, %s2033_s20 }
  0x89   : > { %p1618_p3 = pnand %p1616_p0, %p1870_p9 }
  0x8a   : > { %p1623_p12 = por %p1622_p8, %p1621_p6 }
  0x8b   : > { %p1619_p4 = pneg %p1618_p3 }
  0x8c   : > { %p1625_p2 = por %p1624_p1, %p1623_p12 }
  0x8e   : > { %p1626_p13 = pnand %p1625_p2, %p1619_p4 }
  0x90   : > { %1629 = shalt.err (!%p1626_p13)
}
  0x91   : > { %s1630_s24 = scalar_lea.vmem %s2035_s16, 1024  ;;  %s1749_s6 = smov [#allocation10]  }
  0x92   : > { %p1631_p11 = scmp.ne.s32.totalorder %s2035_s16, %s1630_s24  ;;  %s1635_s17 = sshll.u32 %s1749_s6, 4  ;;  %s1636_s17 = int_to_ptr.vmem [resolvable:$false] %s1635_s17 }
  0x93   : > { %s1637_s14 = scalar_lea.vmem %s1636_s17, 2048  ;;  %p1638_p0 = scmp.lt.s32.totalorder %s2035_s16, %s1636_s17 }
  0x94   : > { %p1633_p5 = pnand %p1631_p11, %p1870_p9  ;;  %p1639_p3 = scmp.lt.s32.totalorder %s1637_s14, %s1630_s24 }
  0x96   : > { %p1634_p10 = pneg %p1633_p5  ;;  %p1640_p6 = por %p1639_p3, %p1638_p0 }
  0x98   : > { %p1641_p8 = pnand %p1640_p6, %p1634_p10 }
  0x9a   : > { %1644 = shalt.err (!%p1641_p8)
}
  0x9b   : > { %1362 = dma.hbm_to_vmem [thread:$0]  (!%p1845_p7), %s2033_s20, 1024, %s2035_s16, %s292_s29, %s1747_s1, %s1747_s1, %s1748_s9  }
  0x9c   : > { %p2487_p9 = scmp.ne.s32.totalorder %s2479_s7, 0 }
  0x9d   : > { %p2488_p4 = scmp.eq.s32.totalorder (!%p2487_p9), %s1898_s25, 0 }
  0x9e   : > { %314 = sbr.rel (%p2487_p9) target bundleno = 604 (0x25c), region = 40 }
  0xa5   : > { %1698 = dma.done.wait (%p2488_p4), [#allocation5], 16   ;;  %p2489_p12 = pmov %p2488_p4 }
  0xa6   : > { %s2071_s30 = sand.u32 1, %s1723_s19   ;;  %p2490_p7 = scmp.ne.s32.totalorder %s2475_s8, 0 }
  0xa7   : > { %1700 = vsyncadd (%p2489_p12), [#allocation5], 4294967280  ;;  %s2074_s15 = sshll.u32 %s2071_s30, 4  ;;  %s321_s27 = scalar_lea.sflag [#allocation3], %s2071_s30 }
  0xa8   : > { %s324_s1 = scalar_lea.vmem [#allocation6], %s2074_s15 }
  0xa9   : > { %1702 = dma.done.wait (%p2490_p7), %s321_s27, 256  }
  0xaa   : > { %1704 = vsyncadd (%p2490_p7), %s321_s27, 4294967040  ;;  %s329_s7 = sand.u32 1, %s1898_s25   ;;  %s333_s20 = scalar_lea.vmem [#allocation7], %s2074_s15 }
  0xab   : > { %s330_s9 = scalar_lea.sflag [#allocation8], %s329_s7 }
  0xac   : > { %1706 = dma.done.wait (%p2490_p7), %s330_s9, 640  }
  0xad   : > { %1708 = vsyncadd (%p2490_p7), %s330_s9, 4294966656  ;;  %s1331_s16 = smul.u32 24, %s2071_s30  ;;  %s1257_s29 = sshll.u32 %s2071_s30, 6 }
  0xae   : > { %s348_s13 = scalar_lea.sflag [#allocation11], %s2071_s30  ;;  %s2093_s26 = scalar_lea.vmem [#allocation10], %s1257_s29 }
  0xaf   : > { %s2090_s11 = scalar_lea.vmem [#allocation9], %s1331_s16 }
  0xb0   : > { %1710 = dma.done.wait (%p2490_p7), %s348_s13, 1024  }
  0xb1   : > { %1712 = vsyncadd (%p2490_p7), %s348_s13, 4294966272 }
  0xb2   : > { %356 = sfence }
  0xb3   : > { %v2101_v0 = vld [vmem:[%s324_s1] sm:$0xff]  ;;  %v1750_v2 = vmov 0   ;;  %v1751_v3 = vmov 0.0   ;;  %v437_v6 = vld [vmem:[%s2093_s26 + $0x8] sm:$0xff]   ;;  %v1752_v8 = vmov 1   ;;  %v1299_v15 = vld [vmem:[%s2090_s11 + $0x10] sm:$0xff]  }
  0xb4   : > { %v435_v1 = vld [vmem:[%s2093_s26] sm:$0xff]   ;;  %1439 = vset.pattern.permute.xlu1 %v1750_v2  ;;  %1309 = vmatprep.subr.bf16.mxu0 %v1751_v3  ;;  %v453_v7 = vunpack.c.l.bf16 %v437_v6  ;;  %v2111_v10 = vld [vmem:[%s324_s1 + $0x8] sm:$0xff]  ;;  %v454_v11 = vunpack.c.h.bf16 %v437_v6  ;;  %v439_v12 = vld [vmem:[%s2093_s26 + $0x10] sm:$0xff]   ;;  %v1296_v21 = vunpack.c.l.bf16 %v1299_v15  ;;  %v746_v22 = vmul.f32 0.5, %v2101_v0  ;;  %s1754_s25 = smov 126   ;;  %s1756_s8 = smov 127  }
  0xb5   : > { %v451_v4 = vunpack.c.l.bf16 %v435_v1  ;;  %v452_v5 = vunpack.c.h.bf16 %v435_v1  ;;  %604 = vperm.xlu1 %1439, %v2101_v0   ;;  %1440 = vset.pattern.permute.xlu0 %v1752_v8  ;;  %v455_v14 = vunpack.c.l.bf16 %v439_v12  ;;  %v456_v17 = vunpack.c.h.bf16 %v439_v12  ;;  %v441_v18 = vld [vmem:[%s2093_s26 + $0x18] sm:$0xff]   ;;  %v443_v27 = vld [vmem:[%s2093_s26 + $0x20] sm:$0xff]   ;;  %v445_v35 = vld [vmem:[%s2093_s26 + $0x28] sm:$0xff]   ;;  %s1262_s2 = sld [smem:[#allocation2 + $0x4]]  ;;  %s1260_s28 = sld [smem:[#allocation2 + $0x2]] }
  0xb6   : > { %1310 = vmatpush3.bf16.msra.mxu0 %v435_v1  ;;  %v457_v20 = vunpack.c.l.bf16 %v441_v18  ;;  %v1297_v23 = vunpack.c.h.bf16 %v1299_v15  ;;  %v458_v25 = vunpack.c.h.bf16 %v441_v18  ;;  %v1263_v26 = vmul.f32 -1.442695, %v1296_v21  ;;  %v447_v40 = vld [vmem:[%s2093_s26 + $0x30] sm:$0xff]   ;;  %v449_v47 = vld [vmem:[%s2093_s26 + $0x38] sm:$0xff]   ;;  %s1259_s23 = sld [smem:[#allocation2 + $0x1]]  ;;  %s2383_s24 = sld [smem:[#allocation2 + $0x3]] }
  0xb7   : > { %v467_v9 = vadd.f32 %v452_v5, %v451_v4  ;;  %1311 = vmatprep.subr.bf16.mxu0 %v1751_v3  ;;  %vm1753_vm0 = vmmov 0   ;;  %v459_v30 = vunpack.c.l.bf16 %v443_v27  ;;  %v747_v32 = vmul.f32 0.5, %v2111_v10  ;;  %v2137_v55 = vld [vmem:[%s2090_s11] sm:$0xff]   ;;  %v1298_v57 = vld [vmem:[%s2090_s11 + $0x8] sm:$0xff]   ;;  %s398_s6 = sld [smem:[#allocation2]]  ;;  %s393_s17 = scalar_lea.vmem [#allocation12], %s2074_s15 }
  0xb8   : > { %v1264_v28 = vmul.f32 -1.442695, %v1297_v23  ;;  %1325 = vmatprep.mubr.msk.bf16.mxu0 %vm1753_vm0, %v1751_v3  ;;  %1480 = vpow2.f32 %v1263_v26  ;;  %v460_v33 = vunpack.c.h.bf16 %v443_v27  ;;  %v1755_v34 = vmov 2   ;;  %s1070_s14 = sshll.u32 %s393_s17, 4  ;;  %s1285_s27 = sshll.u32 %s1731_s21, 8  ;;  %s2394_s14 = int_to_ptr.vmem [resolvable:$true] %s1070_s14 }
  0xb9   : > { %v468_v13 = vadd.f32 %v467_v9, %v453_v7  ;;  %609 = vperm.xlu1 %1439, %v2111_v10   ;;  %v461_v37 = vunpack.c.l.bf16 %v445_v35  ;;  %v462_v39 = vunpack.c.h.bf16 %v445_v35  ;;  %v463_v42 = vunpack.c.l.bf16 %v447_v40  ;;  %s2399_s7 = scalar_lea.hbm %s2453_s5, %s1285_s27  ;;  %s1055_s9 = scalar_lea.sflag [#allocation4], %s2071_s30 }
  0xba   : > { %1312 = vmatpush3.bf16.msra.mxu0 %v437_v6  ;;  %1482 = vpow2.f32 %v1264_v28  ;;  %v464_v45 = vunpack.c.h.bf16 %v447_v40  ;;  %v465_v50 = vunpack.c.l.bf16 %v449_v47  ;;  %v466_v53 = vunpack.c.h.bf16 %v449_v47  ;;  %p2491_p2 = scmp.ne.s32.totalorder %s2477_s10, 0  ;;  %s1763_s21 = smov [#allocation12]  }
  0xbb   : > { %v469_v16 = vadd.f32 %v468_v13, %v454_v11  ;;  %1313 = vmatprep.subr.bf16.mxu0 %v1751_v3  ;;  %v1288_v58 = vunpack.c.l.bf16 %v2137_v55  ;;  %v1289_v59 = vunpack.c.h.bf16 %v2137_v55  ;;  %v1292_v60 = vunpack.c.l.bf16 %v1298_v57  ;;  %s1649_s16 = sshll.u32 %s1763_s21, 4  ;;  %s1650_s16 = int_to_ptr.vmem [resolvable:$false] %s1649_s16 }
  0xbc   : > { %v1293_v62 = vunpack.c.h.bf16 %v1298_v57  ;;  %v1757_v5 = vmov 3   ;;  %v1758_v9 = vmov 4   ;;  %v1759_v11 = vmov 5   ;;  %s1651_s29 = scalar_lea.vmem %s1650_s16, 512  ;;  %p1652_p5 = scmp.lt.s32.totalorder %s2394_s14, %s1650_s16 }
  0xbd   : > { %v470_v19 = vadd.f32 %v469_v16, %v455_v14  ;;  %1441 = vset.pattern.permute.xlu1 %v1752_v8  ;;  %v1761_v13 = vmov 7   ;;  %v612_v14 = vlaneseq }
  0xbe   : > { %625 = vperm.xlu1 %1441, %v2111_v10   ;;  %1314 = vmatpush3.bf16.msra.mxu0 %v439_v12  ;;  %v1760_v12 = vmov 6  }
  0xbf   : > { %v471_v24 = vadd.f32 %v470_v19, %v456_v17  ;;  %1315 = vmatprep.subr.bf16.mxu0 %v1751_v3  ;;  %v2166_v15 = vshrl.u32 %v612_v14, 7  ;;  %v2178_v19 = vld [vmem:[%s333_s20] sm:$0xff] }
  0xc1   : > { %v472_v29 = vadd.f32 %v471_v24, %v457_v20  ;;  %v2171_v17 = vsub.s32 0, %v2166_v15 }
  0xc2   : > { %750 = vrot.lane.b32.xlu1 %v746_v22, %s1754_s25  ;;  %1316 = vmatpush3.bf16.msra.mxu0 %v441_v18  ;;  %v1481_v43 = vpop.eup %1480  ;;  %v2174_v18 = vsub.s32 1, %v2166_v15 }
  0xc3   : > { %v473_v31 = vadd.f32 %v472_v29, %v458_v25  ;;  %1317 = vmatprep.subr.bf16.mxu0 %v1751_v3  ;;  %1442 = vset.pattern.permute.xlu1 %v1755_v34  ;;  %v425_v48 = vadd.f32 1.0, %v1481_v43  ;;  %v2182_v21 = vrot.slane %v2178_v19, %v2171_v17 }
  0xc4   : > { %v1483_v46 = vpop.eup %1482  ;;  %v2186_v22 = vrot.slane %v2178_v19, %v2174_v18 }
  0xc5   : > { %v474_v36 = vadd.f32 %v473_v31, %v459_v30  ;;  %v426_v51 = vadd.f32 1.0, %v1483_v46  ;;  %1484 = vrcp.f32 %v425_v48 }
  0xc6   : > { %752 = vrot.lane.b32.xlu1 %v747_v32, %s1754_s25  ;;  %1318 = vmatpush3.bf16.msra.mxu0 %v443_v27 }
  0xc7   : > { %v475_v38 = vadd.f32 %v474_v36, %v460_v33  ;;  %1319 = vmatprep.subr.bf16.mxu0 %v1751_v3  ;;  %1486 = vrcp.f32 %v426_v51 }
  0xc9   : > { %v476_v41 = vadd.f32 %v475_v38, %v461_v37 }
  0xca   : > { %639 = vperm.xlu1 %1442, %v2101_v0   ;;  %1320 = vmatpush3.bf16.msra.mxu0 %v445_v35 }
  0xcb   : > { %v477_v44 = vadd.f32 %v476_v41, %v462_v39  ;;  %1321 = vmatprep.subr.bf16.mxu0 %v1751_v3  ;;  %v666_v41 = vsub.s32 3, %v2166_v15 }
  0xcd   : > { %v478_v49 = vadd.f32 %v477_v44, %v463_v42 }
  0xce   : > { %766 = vrot.lane.b32.xlu1 %v2101_v0, %s1756_s8  ;;  %1322 = vmatpush3.bf16.msra.mxu0 %v447_v40 }
  0xcf   : > { %v479_v52 = vadd.f32 %v478_v49, %v464_v45  ;;  %1323 = vmatprep.subr.bf16.mxu0 %v1751_v3  ;;  %v1485_v61 = vpop.eup %1484 }
  0xd0   : > { %v431_v1 = vmul.f32 %v1485_v61, %v1288_v58 }
  0xd1   : > { %v480_v54 = vadd.f32 %v479_v52, %v465_v50  ;;  %v1487_v63 = vpop.eup %1486 }
  0xd2   : > { %768 = vrot.lane.b32.xlu1 %v2111_v10, %s1756_s8  ;;  %1324 = vmatpush3.bf16.msra.mxu0 %v449_v47  ;;  %v432_v3 = vmul.f32 %v1487_v63, %v1289_v59  ;;  %v433_v4 = vmul.f32 %v1292_v60, %v431_v1  ;;  %v2212_v47 = vrot.slane %v2178_v19, %v666_v41  ;;  %v2237_v1 = vsub.s32 5, %v2166_v15 }
  0xd3   : > { %v2140_v56 = vadd.f32 %v480_v54, %v466_v53 }
  0xd4   : > { %v434_v6 = vmul.f32 %v1293_v62, %v432_v3  ;;  %488 = vadd.xlane.f32.xlu0 %v433_v4 }
  0xd5   : > { %v482_v39 = vrot.slane %v2140_v56, 4 }
  0xd6   : > { %643 = vperm.xlu1 %1442, %v2111_v10   ;;  %v492_v7 = vpack.c.bf16 %v434_v6, %v433_v4  ;;  %v2240_v4 = vstv %s1262_s2 }
  0xd7   : > { %v483_v44 = vadd.f32 %v482_v39, %v2140_v56 }
  0xd8   : > { %1326 = vmatmul.mubr.bf16.vlgmr.msra.gmra.mrb[0].mxu0 %v492_v7  ;;  %490 = vadd.xlane.f32.xlu0 %v434_v6  ;;  %v701_v7 = vrot.slane %v2178_v19, %v2237_v1 }
  0xd9   : > { %v484_v50 = vrot.slane %v483_v44, 2 }
  0xda   : > { %1443 = vset.pattern.permute.xlu1 %v1757_v5 }
  0xdb   : > { %657 = vperm.xlu1 %1443, %v2101_v0   ;;  %v485_v56 = vadd.f32 %v484_v50, %v483_v44 }
  0xdd   : > { %v486_v61 = vrot.slane %v485_v56, 1 }
  0xdf   : > { %661 = vperm.xlu1 %1443, %v2111_v10   ;;  %v2242_v6 = vadd.f32 %v486_v61, %v485_v56 }
  0xe3   : > { %1444 = vset.pattern.permute.xlu1 %v1758_v9 }
  0xe4   : > { %675 = vperm.xlu1 %1444, %v2101_v0  }
  0xe8   : > { %679 = vperm.xlu1 %1444, %v2111_v10  }
  0xec   : > { %1446 = vset.pattern.permute.xlu1 %v1759_v11 }
  0xed   : > { %695 = vperm.xlu1 %1446, %v2111_v10  }
  0xee   : > { %621 = vperm.xlu0 %1440, %v2101_v0  }
  0xf1   : > { %1447 = vset.pattern.permute.xlu1 %v1760_v12 }
  0xf2   : > { %709 = vperm.xlu1 %1447, %v2101_v0   ;;  %1445 = vset.pattern.permute.xlu0 %v1759_v11 }
  0xf3   : > { %691 = vperm.xlu0 %1445, %v2101_v0  }
  0xf6   : > { %1449 = vset.pattern.permute.xlu1 %v1761_v13 }
  0xf7   : > { %727 = vperm.xlu1 %1449, %v2101_v0   ;;  %1448 = vset.pattern.permute.xlu0 %v1760_v12 }
  0xf8   : > { %713 = vperm.xlu0 %1448, %v2111_v10  }
  0xfb   : > { %731 = vperm.xlu1 %1449, %v2111_v10  }
  0xfc   : > { %1450 = vset.pattern.permute.xlu0 %v1755_v34 }
  0xff   : > { %1451 = vset.pattern.permute.xlu1 %v1755_v34  ;;  %v648_v34 = vsub.s32 2, %v2166_v15 }
 0x101   : > { %v2198_v37 = vrot.slane %v2178_v19, %v648_v34 }
 0x134   : > { %v2168_v16 = vpop.permute.xlu1 %604 }
 0x138   : > { %v610_v20 = vpop.permute.xlu1 %609 }
 0x139   : > { %v617_v23 = vsub.f32 %v610_v20, %v2182_v21 }
 0x13b   : > { %v619_v26 = vand.u32 2147483647, %v617_v23 }
 0x13d   : > { %v626_v24 = vpop.permute.xlu1 %625 }
 0x13e   : > { %v633_v25 = vsub.f32 %v626_v24, %v2186_v22 }
 0x140   : > { %v635_v27 = vand.u32 2147483647, %v633_v25 }
 0x141   : > { %v751_v28 = vpop.permute.xlu1 %750 }
 0x142   : > { %v637_v29 = vadd.f32 %v635_v27, %v619_v26  ;;  %v2204_v42 = vadd.f32 %v751_v28, %v2101_v0  ;;  %v2222_v53 = vsub.f32 %v2101_v0, %v751_v28  ;;  %v718_v26 = vsub.s32 6, %v2166_v15 }
 0x143   : > { %v736_v28 = vsub.s32 7, %v2166_v15 }
 0x145   : > { %v753_v30 = vpop.permute.xlu1 %752 }
 0x146   : > { %v2215_v48 = vsub.f32 %v2111_v10, %v753_v30  ;;  %v759_v49 = vadd.f32 %v753_v30, %v2111_v10 }
 0x149   : > { %v2190_v31 = vpop.permute.xlu1 %639 }
 0x14d   : > { %v767_v32 = vpop.permute.xlu1 %766 }
 0x14e   : > { %v772_v33 = vmul.f32 %v767_v32, %v2101_v0  ;;  %v719_v32 = vrot.slane %v2178_v19, %v718_v26 }
 0x150   : > { %850 = vperm.xlu0 %1450, %v772_v33  }
 0x151   : > { %v769_v35 = vpop.permute.xlu1 %768 }
 0x152   : > { %v773_v36 = vmul.f32 %v769_v35, %v2111_v10  ;;  %v650_v35 = vsub.f32 %v2190_v31, %v2198_v37 }
 0x154   : > { %1453 = vset.pattern.permute.xlu0 %v1760_v12  ;;  %855 = vperm.xlu1 %1451, %v773_v36  }
 0x155   : > { %965 = vperm.xlu0 %1453, %v773_v36   ;;  %v644_v38 = vpop.permute.xlu1 %643 }
 0x156   : > { %v651_v40 = vsub.f32 %v644_v38, %v2198_v37 }
 0x158   : > { %v653_v43 = vand.u32 2147483647, %v651_v40  ;;  %1452 = vset.pattern.permute.xlu1 %v1760_v12 }
 0x159   : > { %1454 = vset.pattern.permute.xlu0 %v1750_v2  ;;  %961 = vperm.xlu1 %1452, %v772_v33   ;;  %v1762_v33 = vmov 8  }
 0x15a   : > { %v655_v45 = vadd.f32 %v653_v43, %v637_v29  ;;  %780 = vperm.xlu0 %1454, %v2204_v42   ;;  %v2209_v46 = vpop.permute.xlu1 %657  ;;  %v616_v29 = vsub.f32 %v2168_v16, %v2182_v21  ;;  %v737_v16 = vrot.slane %v2178_v19, %v736_v28  ;;  %v652_v43 = vand.u32 2147483647, %v650_v35 }
 0x15b   : > { %v668_v36 = vsub.f32 %v2209_v46, %v2212_v47 }
 0x15c   : > { %v618_v21 = vand.u32 2147483647, %v616_v29 }
 0x15d   : > { %1455 = vset.pattern.permute.xlu1 %v1750_v2  ;;  %v2229_v2 = vsub.s32 4, %v2166_v15  ;;  %v670_v44 = vand.u32 2147483647, %v668_v36  ;;  %v1037_v36 = vstv %s1260_s28 }
 0x15e   : > { %801 = vperm.xlu0 %1454, %v2215_v48   ;;  %785 = vperm.xlu1 %1455, %v759_v49   ;;  %v662_v51 = vpop.permute.xlu1 %661 }
 0x15f   : > { %v669_v52 = vsub.f32 %v662_v51, %v2212_v47  ;;  %v685_v62 = vrot.slane %v2178_v19, %v2229_v2 }
 0x161   : > { %v671_v54 = vand.u32 2147483647, %v669_v52  ;;  %v489_v3 = vpop.xlane.xlu0 %488 }
 0x162   : > { %1457 = vset.pattern.permute.xlu0 %v1752_v8  ;;  %796 = vperm.xlu1 %1455, %v2222_v53  }
 0x163   : > { %v2226_v57 = vadd.f32 %v671_v54, %v655_v45  ;;  %819 = vperm.xlu0 %1457, %v759_v49   ;;  %v676_v60 = vpop.permute.xlu1 %675 }
 0x164   : > { %v686_v39 = vsub.f32 %v676_v60, %v685_v62 }
 0x165   : > { %v2252_v23 = vpop.xlane.xlu0 %490 }
 0x166   : > { %1456 = vset.pattern.permute.xlu1 %v1752_v8  ;;  %v583_v8 = vsub.f32 %v2240_v4, %v489_v3  ;;  %v688_v50 = vand.u32 2147483647, %v686_v39 }
 0x167   : > { %1458 = vset.pattern.permute.xlu0 %v1758_v9  ;;  %815 = vperm.xlu1 %1456, %v2204_v42   ;;  %v680_v63 = vpop.permute.xlu1 %679 }
 0x168   : > { %895 = vperm.xlu0 %1458, %v2204_v42   ;;  %v687_v5 = vsub.f32 %v680_v63, %v685_v62  ;;  %v2249_v12 = vsub.f32 %v583_v8, %v2242_v6 }
 0x16a   : > { %v689_v14 = vand.u32 2147483647, %v687_v5 }
 0x16b   : > { %829 = vperm.xlu1 %1456, %v2222_v53  }
 0x16c   : > { %913 = vperm.xlu0 %1458, %v2215_v48   ;;  %v696_v13 = vpop.permute.xlu1 %695 }
 0x16d   : > { %v703_v20 = vsub.f32 %v696_v13, %v701_v7  ;;  %v622_v30 = vpop.permute.xlu0 %621 }
 0x16f   : > { %v705_v24 = vand.u32 2147483647, %v703_v20  ;;  %833 = vperm.xlu1 %1456, %v2215_v48   ;;  %v590_v20 = vadd.f32 1e-06, %v2242_v6 }
 0x170   : > { %1461 = vset.pattern.permute.xlu0 %v1759_v11 }
 0x171   : > { %v707_v25 = vadd.f32 %v705_v24, %v689_v14  ;;  %931 = vperm.xlu0 %1461, %v759_v49   ;;  %v710_v27 = vpop.permute.xlu1 %709  ;;  %1488 = vrcp.f32 %v590_v20 }
 0x172   : > { %v720_v41 = vsub.f32 %v710_v27, %v719_v32 }
 0x173   : > { %1459 = vset.pattern.permute.xlu1 %v1758_v9  ;;  %v632_v9 = vsub.f32 %v622_v30, %v2186_v22 }
 0x174   : > { %899 = vperm.xlu1 %1459, %v759_v49   ;;  %v692_v49 = vpop.permute.xlu0 %691  ;;  %v722_v47 = vand.u32 2147483647, %v720_v41 }
 0x175   : > { %1463 = vset.pattern.permute.xlu0 %v1762_v33  ;;  %v634_v40 = vand.u32 2147483647, %v632_v9  ;;  %v702_v31 = vsub.f32 %v692_v49, %v701_v7 }
 0x176   : > { %v728_v38 = vpop.permute.xlu1 %727 }
 0x177   : > { %v636_v45 = vadd.f32 %v634_v40, %v618_v21  ;;  %v738_v37 = vsub.f32 %v728_v38, %v737_v16  ;;  %v704_v22 = vand.u32 2147483647, %v702_v31 }
 0x178   : > { %909 = vperm.xlu1 %1459, %v2222_v53   ;;  %v714_v61 = vpop.permute.xlu0 %713 }
 0x179   : > { %v654_v46 = vadd.f32 %v652_v43, %v636_v45  ;;  %v706_v56 = vadd.f32 %v704_v22, %v688_v50  ;;  %v740_v60 = vand.u32 2147483647, %v738_v37  ;;  %v721_v62 = vsub.f32 %v714_v61, %v719_v32 }
 0x17a   : > { %v732_v51 = vpop.permute.xlu1 %731 }
 0x17b   : > { %v672_v52 = vadd.f32 %v670_v44, %v654_v46  ;;  %v739_v54 = vsub.f32 %v732_v51, %v737_v16  ;;  %v724_v63 = vadd.f32 %v722_v47, %v706_v56  ;;  %v723_v3 = vand.u32 2147483647, %v721_v62 }
 0x17c   : > { %1460 = vset.pattern.permute.xlu1 %v1759_v11 }
 0x17d   : > { %927 = vperm.xlu1 %1460, %v2204_v42   ;;  %v741_v5 = vand.u32 2147483647, %v739_v54  ;;  %v742_v8 = vadd.f32 %v740_v60, %v724_v63  ;;  %v725_v7 = vadd.f32 %v723_v3, %v707_v25  ;;  %v589_v42 = vsub.f32 %v2240_v4, %v2242_v6 }
 0x17f   : > { %v744_v13 = vmax.f32 %v672_v52, %v742_v8  ;;  %v743_v11 = vadd.f32 %v741_v5, %v725_v7  ;;  %v775_v5 = vrot.slane %v2178_v19, 1 }
 0x181   : > { %941 = vperm.xlu1 %1460, %v2222_v53   ;;  %v745_v14 = vmax.f32 %v2226_v57, %v743_v11  ;;  %v592_v53 = vadd.f32 1e-06, %v589_v42  ;;  %v1489_v57 = vpop.eup %1488  ;;  %v777_v42 = vmul.f32 %v775_v5, %v2178_v19 }
 0x183   : > { %1490 = vrcp.f32 %v592_v53  ;;  %v1039_v16 = vmul.f32 %v1037_v36, %v745_v14 }
 0x185   : > { %945 = vperm.xlu1 %1460, %v2215_v48   ;;  %v584_v48 = vsub.f32 %v2240_v4, %v2252_v23  ;;  %v1034_v4 = vstv %s1259_s23 }
 0x189   : > { %1462 = vset.pattern.permute.xlu1 %v1762_v33 }
 0x18d   : > { %v1491_v24 = vpop.eup %1490 }
 0x190   : > { %1022 = vmax.xlane.f32.xlu0 %v1289_v59  ;;  %v586_v59 = vsub.f32 %v584_v48, %v2242_v6  ;;  %v1038_v6 = vmul.f32 %v1037_v36, %v744_v13 }
 0x1a6   : > { %1011 = vperm.xlu0 %1463, %v2111_v10  }
 0x1a9   : > { %1020 = vmax.xlane.f32.xlu1 %v1288_v58 }
 0x1ab   : > { %v575_v25 = vpop.f32.mrb[0].mxu0 }
 0x1ac   : > { %v587_v27 = vadd.f32 %v2249_v12, %v575_v25  ;;  %v594_v28 = vmul.f32 %v1489_v57, %v575_v25  ;;  %v1327_v29 = vpop.f32.mrb[1].mxu0 }
 0x1ad   : > { %v578_v30 = vpop.f32.mrb[2].mxu0 }
 0x1ae   : > { %v596_v10 = vmul.f32 %v1491_v24, %v587_v27  ;;  %v588_v32 = vadd.f32 %v586_v59, %v578_v30  ;;  %v595_v33 = vmul.f32 %v1489_v57, %v578_v30  ;;  %v1328_v55 = vpop.f32.mrb[3].mxu0  ;;  %v861_v59 = vrot.slane %v777_v42, %v648_v34 }
 0x1b0   : > { %v598_v58 = vadd.f32 %v596_v10, %v594_v28  ;;  %v597_v35 = vmul.f32 %v1491_v24, %v588_v32 }
 0x1b2   : > { %v600_v23 = vmul.f32 -0.5, %v598_v58  ;;  %v599_v9 = vadd.f32 %v597_v35, %v595_v33 }
 0x1b4   : > { %v1035_v38 = vmul.f32 %v1034_v4, %v600_v23  ;;  %v601_v39 = vmul.f32 -0.5, %v599_v9  ;;  %v971_v23 = vrot.slane %v777_v42, %v718_v26 }
 0x1b6   : > { %v2289_v12 = vadd.f32 %v1038_v6, %v1035_v38  ;;  %v1036_v21 = vmul.f32 %v1034_v4, %v601_v39 }
 0x1b8   : > { %v2291_v40 = vadd.f32 %v1039_v16, %v1036_v21 }
 0x1ba   : > { %1007 = vperm.xlu1 %1462, %v2101_v0   ;;  %v760_v0 = vmul.f32 0.5, %v2178_v19 }
 0x1bc   : > { %v762_v51 = vrot.slane %v760_v0, 2 }
 0x1be   : > { %v764_v46 = vsub.f32 %v2178_v19, %v762_v51  ;;  %v765_v52 = vadd.f32 %v762_v51, %v2178_v19 }
 0x1c0   : > { %v2305_v54 = vrot.slane %v764_v46, %v2174_v18  ;;  %v2310_v60 = vrot.slane %v765_v52, %v2171_v17  ;;  %v2313_v61 = vrot.slane %v764_v46, %v2171_v17  ;;  %v2316_v62 = vrot.slane %v765_v52, %v2174_v18 }
 0x1c1   : > { %v2333_v25 = vrot.slane %v765_v52, %v2229_v2  ;;  %v2342_v29 = vrot.slane %v764_v46, %v2229_v2  ;;  %v951_v2 = vrot.slane %v764_v46, %v2237_v1  ;;  %v937_v38 = vrot.slane %v765_v52, %v2237_v1 }
 0x1cf   : > { %v851_v43 = vpop.permute.xlu0 %850 }
 0x1d0   : > { %v862_v35 = vadd.f32 %v861_v59, %v851_v43 }
 0x1d3   : > { %v856_v41 = vpop.permute.xlu1 %855 }
 0x1d4   : > { %v2295_v45 = vpop.permute.xlu0 %965  ;;  %v863_v39 = vadd.f32 %v861_v59, %v856_v41 }
 0x1d8   : > { %v2293_v44 = vpop.permute.xlu1 %961 }
 0x1d9   : > { %v781_v31 = vpop.permute.xlu0 %780  ;;  %v972_v1 = vadd.f32 %v971_v23, %v2293_v44 }
 0x1da   : > { %v792_v13 = vmin.f32 %v781_v31, %v2310_v60  ;;  %v866_v36 = vmax.f32 %v781_v31, %v2310_v60 }
 0x1dd   : > { %v2297_v49 = vpop.permute.xlu1 %785  ;;  %v2301_v22 = vpop.permute.xlu0 %801 }
 0x1de   : > { %v809_v27 = vmax.f32 %v2301_v22, %v2313_v61  ;;  %v793_v19 = vmin.f32 %v2297_v49, %v2310_v60 }
 0x1e0   : > { %v811_v9 = vsub.f32 %v793_v19, %v809_v27  ;;  %v867_v27 = vmax.f32 %v2297_v49, %v2310_v60 }
 0x1e1   : > { %v797_v50 = vpop.permute.xlu1 %796 }
 0x1e2   : > { %v2318_v63 = vpop.permute.xlu0 %819  ;;  %v808_v8 = vmax.f32 %v797_v50, %v2313_v61  ;;  %v868_v30 = vmin.f32 %v797_v50, %v2313_v61  ;;  %v813_v41 = vmax.f32 %v811_v9, 0.0 }
 0x1e3   : > { %v827_v28 = vmin.f32 %v2318_v63, %v2316_v62 }
 0x1e4   : > { %v810_v20 = vsub.f32 %v792_v13, %v808_v8  ;;  %v870_v16 = vsub.f32 %v866_v36, %v868_v30 }
 0x1e6   : > { %v816_v37 = vpop.permute.xlu1 %815  ;;  %v812_v24 = vmax.f32 %v810_v20, 0.0 }
 0x1e7   : > { %v826_v7 = vmin.f32 %v816_v37, %v2316_v62  ;;  %v896_v18 = vpop.permute.xlu0 %895  ;;  %v872_v4 = vmax.f32 %v816_v37, %v2316_v62 }
 0x1e8   : > { %v906_v6 = vmin.f32 %v896_v18, %v2333_v25  ;;  %v976_v52 = vmax.f32 %v896_v18, %v2333_v25  ;;  %v869_v18 = vmin.f32 %v2301_v22, %v2313_v61 }
 0x1ea   : > { %v830_v47 = vpop.permute.xlu1 %829 }
 0x1eb   : > { %v840_v3 = vmax.f32 %v830_v47, %v2305_v54  ;;  %v874_v34 = vmin.f32 %v830_v47, %v2305_v54  ;;  %v2348_v32 = vpop.permute.xlu0 %913 }
 0x1ec   : > { %v921_v5 = vmax.f32 %v2348_v32, %v2342_v29  ;;  %v979_v22 = vmin.f32 %v2348_v32, %v2342_v29 }
 0x1ed   : > { %v842_v11 = vsub.f32 %v826_v7, %v840_v3  ;;  %v876_v43 = vsub.f32 %v872_v4, %v874_v34 }
 0x1ee   : > { %v2307_v56 = vpop.permute.xlu1 %833 }
 0x1ef   : > { %v844_v53 = vmax.f32 %v842_v11, 0.0  ;;  %v841_v57 = vmax.f32 %v2307_v56, %v2305_v54  ;;  %v878_v8 = vmul.f32 %v876_v43, %v870_v16  ;;  %v875_v19 = vmin.f32 %v2307_v56, %v2305_v54 }
 0x1f0   : > { %v932_v26 = vpop.permute.xlu0 %931  ;;  %v973_v54 = vadd.f32 %v971_v23, %v2295_v45 }
 0x1f1   : > { %v2345_v10 = vmul.f32 %v844_v53, %v812_v24  ;;  %v843_v33 = vsub.f32 %v827_v28, %v841_v57  ;;  %v939_v42 = vmin.f32 %v932_v26, %v937_v38  ;;  %v983_v30 = vmax.f32 %v932_v26, %v937_v38 }
 0x1f3   : > { %v2325_v14 = vpop.permute.xlu1 %899  ;;  %v2359_v21 = vsub.f32 %v862_v35, %v2345_v10  ;;  %v845_v50 = vmax.f32 %v843_v33, 0.0 }
 0x1f4   : > { %v907_v0 = vmin.f32 %v2325_v14, %v2333_v25  ;;  %v977_v34 = vmax.f32 %v2325_v14, %v2333_v25 }
 0x1f5   : > { %1492 = vrcp.f32 %v2359_v21  ;;  %v847_v11 = vmul.f32 %v845_v50, %v813_v41  ;;  %v1042_v41 = vstv %s2383_s24 }
 0x1f6   : > { %v923_v20 = vsub.f32 %v907_v0, %v921_v5  ;;  %1494 = vrcp.f32 %v878_v8  ;;  %v981_v4 = vsub.f32 %v977_v34, %v979_v22 }
 0x1f7   : > { %v910_v48 = vpop.permute.xlu1 %909  ;;  %v865_v61 = vsub.f32 %v863_v39, %v847_v11 }
 0x1f8   : > { %v920_v55 = vmax.f32 %v910_v48, %v2342_v29  ;;  %v978_v37 = vmin.f32 %v910_v48, %v2342_v29  ;;  %v925_v35 = vmax.f32 %v923_v20, 0.0 }
 0x1fa   : > { %v922_v31 = vsub.f32 %v906_v6, %v920_v55  ;;  %v980_v53 = vsub.f32 %v976_v52, %v978_v37 }
 0x1fc   : > { %v928_v58 = vpop.permute.xlu1 %927  ;;  %v924_v57 = vmax.f32 %v922_v31, 0.0 }
 0x1fd   : > { %v938_v51 = vmin.f32 %v928_v58, %v937_v38  ;;  %v982_v46 = vmax.f32 %v928_v58, %v937_v38  ;;  %v873_v58 = vmax.f32 %v2318_v63, %v2316_v62 }
 0x1ff   : > { %v877_v56 = vsub.f32 %v873_v58, %v875_v19  ;;  %v1493_v25 = vpop.eup %1492 }
 0x200   : > { %v942_v15 = vpop.permute.xlu1 %941  ;;  %v881_v29 = vmul.f32 %v1493_v25, %v2345_v10  ;;  %v1495_v32 = vpop.eup %1494 }
 0x201   : > { %v952_v47 = vmax.f32 %v942_v15, %v951_v2  ;;  %v984_v3 = vmin.f32 %v942_v15, %v951_v2  ;;  %v887_v23 = vmul.f32 %v1495_v32, %v2359_v21 }
 0x202   : > { %v1273_v38 = vadd.f32 -1.0, %v881_v29 }
 0x203   : > { %v954_v7 = vsub.f32 %v938_v51, %v952_v47  ;;  %v986_v13 = vsub.f32 %v982_v46, %v984_v3 }
 0x204   : > { %v946_v48 = vpop.permute.xlu1 %945  ;;  %v890_v43 = vadd.f32 %v1273_v38, %v887_v23 }
 0x205   : > { %v956_v59 = vmax.f32 %v954_v7, 0.0  ;;  %v953_v24 = vmax.f32 %v946_v48, %v951_v2  ;;  %v985_v44 = vmin.f32 %v946_v48, %v951_v2  ;;  %v988_v28 = vmul.f32 %v986_v13, %v980_v53  ;;  %v406_v48 = vld [vmem:[%s333_s20 + $0x8] sm:$0xff]  ;;  %s1645_s20 = scalar_lea.vmem %s2394_s14, 256 }
 0x206   : > { %v871_v2 = vsub.f32 %v867_v27, %v869_v18  ;;  %v892_v51 = vsub.f32 0.0, %v890_v43  ;;  %p1646_p1 = scmp.ne.s32.totalorder %s2394_s14, %s1645_s20  ;;  %p1653_p10 = scmp.lt.s32.totalorder %s1651_s29, %s1645_s20 }
 0x207   : > { %v958_v33 = vmul.f32 %v956_v59, %v924_v57  ;;  %v955_v55 = vsub.f32 %v939_v42, %v953_v24  ;;  %v987_v36 = vsub.f32 %v983_v30, %v985_v44  ;;  %1496 = vrcp.f32 %v988_v28 }
 0x208   : > { %v879_v9 = vmul.f32 %v877_v56, %v871_v2  ;;  %v1017_v59 = vrot.slane %v406_v48, %v2171_v17  ;;  %v1047_v30 = vstv %s398_s6  ;;  %p1647_p13 = pnand %p1646_p1, %p2491_p2  ;;  %p1654_p0 = por %p1653_p10, %p1652_p5 }
 0x209   : > { %v974_v49 = vsub.f32 %v972_v1, %v958_v33  ;;  %v957_v60 = vmax.f32 %v955_v55, 0.0  ;;  %v989_v63 = vmul.f32 %v987_v36, %v981_v4 }
 0x20a   : > { %p1648_p11 = pneg %p1647_p13 }
 0x20b   : > { %1498 = vrcp.f32 %v974_v49  ;;  %v959_v14 = vmul.f32 %v957_v60, %v925_v35 }
 0x20c   : > { %1500 = vrcp.f32 %v865_v61  ;;  %p1655_p3 = pnand %p1654_p0, %p1648_p11 }
 0x20d   : > { %v975_v62 = vsub.f32 %v973_v54, %v959_v14 }
 0x20f   : > { %1502 = vrcp.f32 %v975_v62 }
 0x210   : > { %1504 = vrcp.f32 %v989_v63 }
 0x211   : > { %1506 = vrcp.f32 %v879_v9  ;;  %v1497_v6 = vpop.eup %1496 }
 0x212   : > { %v997_v0 = vmul.f32 %v1497_v6, %v974_v49 }
 0x215   : > { %v1499_v45 = vpop.eup %1498 }
 0x216   : > { %v991_v39 = vmul.f32 %v1499_v45, %v958_v33  ;;  %v1501_v16 = vpop.eup %1500 }
 0x217   : > { %v883_v37 = vmul.f32 %v1501_v16, %v847_v11 }
 0x218   : > { %v1275_v50 = vadd.f32 -1.0, %v991_v39 }
 0x219   : > { %v1503_v31 = vpop.eup %1502  ;;  %v1274_v52 = vadd.f32 -1.0, %v883_v37 }
 0x21a   : > { %v1000_v15 = vadd.f32 %v1275_v50, %v997_v0  ;;  %v993_v10 = vmul.f32 %v1503_v31, %v959_v14  ;;  %v1505_v26 = vpop.eup %1504 }
 0x21b   : > { %v1507_v3 = vpop.eup %1506  ;;  %v999_v21 = vmul.f32 %v1505_v26, %v975_v62 }
 0x21c   : > { %v1002_v46 = vsub.f32 0.0, %v1000_v15  ;;  %v1276_v47 = vadd.f32 -1.0, %v993_v10  ;;  %v889_v7 = vmul.f32 %v1507_v3, %v865_v61 }
 0x21d   : > { %v1023_v1 = vpop.xlane.xlu0 %1022 }
 0x21e   : > { %v1025_v5 = vadd.f32 1e-06, %v1023_v1  ;;  %v1004_v8 = vmax.f32 %v892_v51, %v1002_v46  ;;  %v1001_v13 = vadd.f32 %v1276_v47, %v999_v21  ;;  %v891_v20 = vadd.f32 %v1274_v52, %v889_v7 }
 0x220   : > { %1508 = vlog2.f32 %v1025_v5  ;;  %v1043_v42 = vmul.f32 %v1042_v41, %v1004_v8  ;;  %v1003_v53 = vsub.f32 0.0, %v1001_v13  ;;  %v893_v57 = vsub.f32 0.0, %v891_v20 }
 0x222   : > { %v1045_v11 = vadd.f32 %v1043_v42, %v2289_v12  ;;  %v1005_v24 = vmax.f32 %v893_v57, %v1003_v53 }
 0x224   : > { %v1044_v19 = vmul.f32 %v1042_v41, %v1005_v24 }
 0x225   : > { %v1012_v44 = vpop.permute.xlu0 %1011 }
 0x226   : > { %vm1019_vm1 = vcmp.eq.f32.partialorder %v1012_v44, %v1017_v59  ;;  %v1046_v12 = vadd.f32 %v1044_v19, %v2291_v40 }
 0x22a   : > { %v1509_v18 = vpop.eup %1508 }
 0x22b   : > { %v1029_v27 = vmul.f32 0.6931472, %v1509_v18 }
 0x22d   : > { %v1031_v28 = vsub.f32 0.0, %v1029_v27 }
 0x22f   : > { %v1033_v34 = vsel %vm1019_vm1, %v1031_v28, 13.815511 }
 0x230   : > { %v1049_v33 = vmul.f32 %v1047_v30, %v1033_v34 }
 0x232   : > { %v1051_v55 = vadd.f32 %v1049_v33, %v1046_v12 }
 0x234   : > { %1053 = vst [vmem:[%s393_s17 + $0x8] sm:$0xff] %v1051_v55 }
 0x236   : > { %v1021_v58 = vpop.xlane.xlu1 %1020 }
 0x237   : > { %v1024_v22 = vadd.f32 1e-06, %v1021_v58 }
 0x239   : > { %1510 = vlog2.f32 %v1024_v22 }
 0x23a   : > { %v1008_v17 = vpop.permute.xlu1 %1007 }
 0x23b   : > { %vm1018_vm2 = vcmp.eq.f32.partialorder %v1008_v17, %v1017_v59 }
 0x243   : > { %v1511_v61 = vpop.eup %1510 }
 0x244   : > { %v1027_v35 = vmul.f32 0.6931472, %v1511_v61 }
 0x246   : > { %v1030_v49 = vsub.f32 0.0, %v1027_v35 }
 0x248   : > { %v1032_v60 = vsel %vm1018_vm2, %v1030_v49, 13.815511 }
 0x249   : > { %v1048_v40 = vmul.f32 %v1047_v30, %v1032_v60 }
 0x24b   : > { %v1050_v36 = vadd.f32 %v1048_v40, %v1045_v11 }
 0x24d   : > { %1052 = vst [vmem:[%s393_s17] sm:$0xff] %v1050_v36 }
 0x24e   : > { %1658 = shalt.err (!%p1655_p3)
}
 0x24f   : > { %s1659_s11 = scalar_lea.hbm %s2399_s7, 256  ;;  %s1663_s25 = scalar_lea.hbm %s2453_s5, 512 }
 0x250   : > { %p1660_p6 = scmp.ne.s32.totalorder %s2399_s7, %s1659_s11  ;;  %p1664_p4 = scmp.lt.u32.totalorder %s2399_s7, %s2453_s5 }
 0x251   : > { %p1665_p12 = scmp.lt.u32.totalorder %s1663_s25, %s1659_s11  ;;  %p1667_p1 = scmp.lt.u32.totalorder %s1659_s11, %s2399_s7 }
 0x252   : > { %p1661_p8 = pnand %p1660_p6, %p2491_p2 }
 0x253   : > { %p1666_p7 = por %p1665_p12, %p1664_p4 }
 0x254   : > { %p1662_p9 = pneg %p1661_p8 }
 0x255   : > { %p1668_p13 = por %p1667_p1, %p1666_p7 }
 0x257   : > { %p1669_p11 = pnand %p1668_p13, %p1662_p9 }
 0x259   : > { %1672 = shalt.err (!%p1669_p11)
}
 0x25a   : > { %s1764_s28 = smov 128   ;;  %s1765_s23 = smov 8  }
 0x25b   : > { %1344 = dma.vmem_to_hbm [thread:$0]  (%p2491_p2), %s2394_s14, 256, %s2399_s7, %s1055_s9, %s1764_s28, %s1764_s28, %s1765_s23  }
 0x25c PF: > { %s2492_s24 = sld [smem:[#allocation19_spill]]  ;;  %s1085_s6 = sand.u32 1, %s1719_s18  }
 0x25d   : > { %p2493_p5 = scmp.ne.s32.totalorder %s2478_s12, 0  ;;  %s1086_s17 = scalar_lea.sflag [#allocation4], %s1085_s6 }
 0x262   : > { %p2494_p10 = scmp.ge.s32.totalorder %s2492_s24, 2 }
 0x264   : > { %p1364_p0 = pnand %p2494_p10, %p2493_p5 }
 0x266   : > { %1714 = dma.done.wait (!%p1364_p0), %s1086_s17, 256  }
 0x267   : > { %1716 = vsyncadd (!%p1364_p0), %s1086_s17, 4294967040  ;;  %s28_s23 = sadd.s32 1, %s2492_s24   ;;  %s2495_s27 = sld [smem:[#allocation18_spill]] }
 0x268   : > { %p25_p3 = scmp.ge.s32.totalorder %s28_s23, 4   ;;  %s2496_s20 = sld [smem:[#allocation21_spill]] }
 0x269   : > { %s2497_s10 = sld [smem:[#allocation20_spill]]  ;;  %s2498_s18 = smov %s1723_s19 }
 0x26a   : > { %s2500_s21 = smov %s1735_s22  ;;  %27 = sbr.rel (!%p25_p3) target bundleno = 14 (0xe), region = 127 }
 0x26d   : > { %s2499_s19 = smov %s2495_s27 }
 0x26f   : > { %s2501_s22 = smov %s2497_s10 }
 0x271   :  { %1091 = vsyncpa [#allocation3], 1 }
 0x272   :  { %1093 = vsyncpa [#allocation3 + $0x1], 1 }
 0x273   :  { %1094 = vsyncpa [#allocation8], 1 }
 0x274   :  { %1096 = vsyncpa [#allocation8 + $0x1], 1 }
 0x275   :  { %1097 = vsyncpa [#allocation11], 1 }
 0x276   :  { %1099 = vsyncpa [#allocation11 + $0x1], 1 }
 0x277   :  { %1100 = vsyncpa [#allocation4], 1 }
 0x278   :  { %1102 = vsyncpa [#allocation4 + $0x1], 1 }
 0x279   :  { %1103 = vsyncpa [#allocation5], 1 }
 0x27a   :  { %1105 = vsyncpa [#allocation5 + $0x1], 1 }

</bundles_post_ra>
